<compile_context>
chip_gen: v5e
topology: v5e:2x2
jax: 0.10.0
libtpu: 0.0.40
codegen_flags: <defaults>
</compile_context>

<pallas_src>
import functools

import jax
import jax.numpy as jnp
from jax.experimental import pallas as pl
from jax.experimental.pallas import tpu as pltpu

IN_DIM = 784
HID_DIM = 256
OUT_DIM = 784

LANE = 128
SUBLANE = 8
PAD_IN = ((IN_DIM + LANE - 1) // LANE) * LANE    # 896
PAD_OUT = ((OUT_DIM + LANE - 1) // LANE) * LANE  # 896


def _round_up(x, m):
    return ((x + m - 1) // m) * m


def generator_kernel(x_ref, w1_ref, b1_ref, w2_ref, b2_ref, w3_ref, b3_ref, o_ref):
    # Layer 1: Linear(784->256) + ReLU   (x, w1 are bf16; accumulate f32 on MXU)
    h1 = jnp.dot(x_ref[...], w1_ref[...], preferred_element_type=jnp.float32)
    h1 = jnp.maximum(h1 + b1_ref[...], 0.0)
    # Layer 2: Linear(256->256) + ReLU
    h2 = jnp.dot(h1.astype(w2_ref.dtype), w2_ref[...],
                 preferred_element_type=jnp.float32)
    h2 = jnp.maximum(h2 + b2_ref[...], 0.0)
    # Layer 3: Linear(256->784) + Tanh
    h3 = jnp.dot(h2.astype(w3_ref.dtype), w3_ref[...],
                 preferred_element_type=jnp.float32)
    o_ref[...] = jnp.tanh(h3 + b3_ref[...]).astype(o_ref.dtype)


@functools.partial(jax.jit, static_argnames=("tile_b", "weight_dtype"))
def generator_forward(x, params, *, tile_b=None, weight_dtype=jnp.bfloat16):
    """x: (B, 784) float32. params: w1,b1,w2,b2,w3,b3 with weights in (in, out) layout."""
    B = x.shape[0]

    # Batch tile: multiple of 8 sublanes; cap at 512 so the same tile fits v7x's
    # 64 MiB VMEM comfortably (v5e/v6e could go larger, 512 is already past the
    # measured roofline knee).
    if tile_b is None:
        tile_b = min(512, _round_up(B, SUBLANE))
    tile_b = _round_up(tile_b, SUBLANE)
    b_pad = _round_up(max(B, tile_b), tile_b)
    grid_b = b_pad // tile_b

    wbytes = jnp.dtype(weight_dtype).itemsize

    # Pad + cast inputs/weights (lane-dense 896 instead of ragged 784).
    x_p = jnp.zeros((b_pad, PAD_IN), weight_dtype).at[:B, :IN_DIM].set(
        x.astype(weight_dtype))
    w1 = jnp.zeros((PAD_IN, HID_DIM), weight_dtype).at[:IN_DIM, :].set(
        params["w1"].astype(weight_dtype))
    w2 = params["w2"].astype(weight_dtype)
    w3 = jnp.zeros((HID_DIM, PAD_OUT), weight_dtype).at[:, :OUT_DIM].set(
        params["w3"].astype(weight_dtype))
    b1 = params["b1"].reshape(1, HID_DIM).astype(jnp.float32)
    b2 = params["b2"].reshape(1, HID_DIM).astype(jnp.float32)
    b3 = jnp.zeros((1, PAD_OUT), jnp.float32).at[:, :OUT_DIM].set(
        params["b3"].reshape(1, OUT_DIM).astype(jnp.float32))

    # Right-sized VMEM budget: double-buffered x/out tiles + resident weights
    # (budgeted x2 for the pipeline's buffering) + activation headroom + slack.
    vmem_bytes = (
        2 * tile_b * PAD_IN * wbytes                               # x tiles
        + 2 * tile_b * PAD_OUT * 4                                 # out tiles (f32)
        + 2 * (PAD_IN * HID_DIM + HID_DIM * HID_DIM + HID_DIM * PAD_OUT) * wbytes
        + 2 * (HID_DIM + HID_DIM + PAD_OUT) * 4                    # biases
        + 4 * tile_b * HID_DIM * 4                                 # h1/h2 headroom
        + (4 << 20)                                                # compiler slack
    )
    vmem_bytes = int(min(max(vmem_bytes, 8 << 20), 32 << 20))

    resident = lambda shape: pl.BlockSpec(shape, lambda i: (0, 0))

    out_p = pl.pallas_call(
        generator_kernel,
        out_shape=jax.ShapeDtypeStruct((b_pad, PAD_OUT), jnp.float32),
        grid=(grid_b,),
        in_specs=[
            pl.BlockSpec((tile_b, PAD_IN), lambda i: (i, 0)),   # x: pipelined per tile
            resident((PAD_IN, HID_DIM)),                        # w1 (VMEM-resident)
            resident((1, HID_DIM)),                             # b1
            resident((HID_DIM, HID_DIM)),                       # w2
            resident((1, HID_DIM)),                             # b2
            resident((HID_DIM, PAD_OUT)),                       # w3
            resident((1, PAD_OUT)),                             # b3
        ],
        out_specs=pl.BlockSpec((tile_b, PAD_OUT), lambda i: (i, 0)),
        compiler_params=pltpu.CompilerParams(
            dimension_semantics=("parallel",),
            vmem_limit_bytes=vmem_bytes,
        ),
    )(x_p, w1, b1, w2, b2, w3, b3)

    return out_p[:B, :OUT_DIM]


def init_params(key):
    """Deterministic init mirroring nn.Linear default (uniform +/- 1/sqrt(fan_in))."""
    ks = jax.random.split(key, 6)

    def linear(kw, kb, fan_in, fan_out):
        bound = 1.0 / jnp.sqrt(fan_in)
        w = jax.random.uniform(kw, (fan_in, fan_out), jnp.float32, -bound, bound)
        b = jax.random.uniform(kb, (fan_out,), jnp.float32, -bound, bound)
        return w, b

    w1, b1 = linear(ks[0], ks[1], IN_DIM, HID_DIM)
    w2, b2 = linear(ks[2], ks[3], HID_DIM, HID_DIM)
    w3, b3 = linear(ks[4], ks[5], HID_DIM, OUT_DIM)
    return {"w1": w1, "b1": b1, "w2": w2, "b2": b2, "w3": w3, "b3": b3}


if __name__ == "__main__":
    key = jax.random.PRNGKey(0)
    k_param, k_x = jax.random.split(key)
    params = init_params(k_param)

    # Small batch, deliberately NOT a multiple of the tile so the pad/slice path
    # and a multi-step (grid=3) pipelined batch axis are both exercised.
    B = 20
    x = jax.random.normal(k_x, (B, IN_DIM), jnp.float32)

    out = generator_forward(x, params, tile_b=8)
    out = jax.block_until_ready(out)
    assert out.shape == (B, OUT_DIM)

    # Reference 1: mirrors the kernel arithmetic (bf16 operands, f32 accumulate).
    f32 = jnp.float32
    hp = jax.lax.Precision.HIGHEST
    bf = lambda a: a.astype(jnp.bfloat16).astype(f32)
    h1 = jnp.maximum(jnp.dot(bf(x), bf(params["w1"]), precision=hp) + params["b1"], 0.0)
    h2 = jnp.maximum(jnp.dot(bf(h1), bf(params["w2"]), precision=hp) + params["b2"], 0.0)
    ref_bf = jnp.tanh(jnp.dot(bf(h2), bf(params["w3"]), precision=hp) + params["b3"])
    assert jnp.allclose(out, ref_bf, atol=1e-3, rtol=1e-3)

    # Reference 2: full-f32 PyTorch-equivalent forward (looser tol: bf16 weights).
    h1f = jnp.maximum(jnp.dot(x, params["w1"], precision=hp) + params["b1"], 0.0)
    h2f = jnp.maximum(jnp.dot(h1f, params["w2"], precision=hp) + params["b2"], 0.0)
    ref_f32 = jnp.tanh(jnp.dot(h2f, params["w3"], precision=hp) + params["b3"])
    assert jnp.allclose(out, ref_f32, atol=5e-2, rtol=5e-2)

    print("KERNEL_OK")
</pallas_src>

<mosaic_0001>
module attributes {stable_mosaic.version = 11 : i64} {
  func.func @generator_kernel(%arg0: i32, %arg1: memref<8x896xbf16, #tpu.memory_space<vmem>>, %arg2: memref<896x256xbf16, #tpu.memory_space<vmem>>, %arg3: memref<1x256xf32, #tpu.memory_space<vmem>>, %arg4: memref<256x256xbf16, #tpu.memory_space<vmem>>, %arg5: memref<1x256xf32, #tpu.memory_space<vmem>>, %arg6: memref<256x896xbf16, #tpu.memory_space<vmem>>, %arg7: memref<1x896xf32, #tpu.memory_space<vmem>>, %arg8: memref<8x896xf32, #tpu.memory_space<vmem>>) attributes {dimension_semantics = [#tpu.dimension_semantics<parallel>], iteration_bounds = array<i64: 3>, scalar_prefetch = 0 : i64, scratch_operands = 0 : i64, tpu.core_type = #tpu.core_type<tc>, window_params = [{transform_indices = @transform_0, window_bounds = array<i64: 8, 896>}, {pipeline_mode = #tpu.pipeline_mode<synchronous>, transform_indices = @transform_1, window_bounds = array<i64: 896, 256>}, {pipeline_mode = #tpu.pipeline_mode<synchronous>, transform_indices = @transform_2, window_bounds = array<i64: 1, 256>}, {pipeline_mode = #tpu.pipeline_mode<synchronous>, transform_indices = @transform_3, window_bounds = array<i64: 256, 256>}, {pipeline_mode = #tpu.pipeline_mode<synchronous>, transform_indices = @transform_4, window_bounds = array<i64: 1, 256>}, {pipeline_mode = #tpu.pipeline_mode<synchronous>, transform_indices = @transform_5, window_bounds = array<i64: 256, 896>}, {pipeline_mode = #tpu.pipeline_mode<synchronous>, transform_indices = @transform_6, window_bounds = array<i64: 1, 896>}, {transform_indices = @transform_7, window_bounds = array<i64: 8, 896>}]} {
    %c0 = arith.constant 0 : index
    %c0_0 = arith.constant 0 : index
    %0 = vector.load %arg1[%c0, %c0_0] : memref<8x896xbf16, #tpu.memory_space<vmem>>, vector<8x896xbf16>
    %c0_1 = arith.constant 0 : index
    %c0_2 = arith.constant 0 : index
    %1 = vector.load %arg2[%c0_1, %c0_2] : memref<896x256xbf16, #tpu.memory_space<vmem>>, vector<896x256xbf16>
    %cst = arith.constant dense<0.000000e+00> : vector<8x256xf32>
    %2 = tpu.matmul %0, %1, %cst {dimension_numbers = #tpu.dot_dimension_numbers<[1], [0], [0], [1], [0, 0, 1, 1], [], []>} : vector<8x896xbf16>, vector<896x256xbf16>, vector<8x256xf32> -> vector<8x256xf32>
    %c0_3 = arith.constant 0 : index
    %c0_4 = arith.constant 0 : index
    %3 = vector.load %arg3[%c0_3, %c0_4] : memref<1x256xf32, #tpu.memory_space<vmem>>, vector<1x256xf32>
    %4 = vector.broadcast %3 : vector<1x256xf32> to vector<8x256xf32>
    %5 = arith.addf %2, %4 : vector<8x256xf32>
    %cst_5 = arith.constant 0.000000e+00 : f32
    %6 = vector.broadcast %cst_5 : f32 to vector<8x256xf32>
    %7 = arith.maximumf %5, %6 : vector<8x256xf32>
    %8 = arith.truncf %7 : vector<8x256xf32> to vector<8x256xbf16>
    %c0_6 = arith.constant 0 : index
    %c0_7 = arith.constant 0 : index
    %9 = vector.load %arg4[%c0_6, %c0_7] : memref<256x256xbf16, #tpu.memory_space<vmem>>, vector<256x256xbf16>
    %cst_8 = arith.constant dense<0.000000e+00> : vector<8x256xf32>
    %10 = tpu.matmul %8, %9, %cst_8 {dimension_numbers = #tpu.dot_dimension_numbers<[1], [0], [0], [1], [0, 0, 1, 1], [], []>} : vector<8x256xbf16>, vector<256x256xbf16>, vector<8x256xf32> -> vector<8x256xf32>
    %c0_9 = arith.constant 0 : index
    %c0_10 = arith.constant 0 : index
    %11 = vector.load %arg5[%c0_9, %c0_10] : memref<1x256xf32, #tpu.memory_space<vmem>>, vector<1x256xf32>
    %12 = vector.broadcast %11 : vector<1x256xf32> to vector<8x256xf32>
    %13 = arith.addf %10, %12 : vector<8x256xf32>
    %cst_11 = arith.constant 0.000000e+00 : f32
    %14 = vector.broadcast %cst_11 : f32 to vector<8x256xf32>
    %15 = arith.maximumf %13, %14 : vector<8x256xf32>
    %16 = arith.truncf %15 : vector<8x256xf32> to vector<8x256xbf16>
    %c0_12 = arith.constant 0 : index
    %c0_13 = arith.constant 0 : index
    %17 = vector.load %arg6[%c0_12, %c0_13] : memref<256x896xbf16, #tpu.memory_space<vmem>>, vector<256x896xbf16>
    %cst_14 = arith.constant dense<0.000000e+00> : vector<8x896xf32>
    %18 = tpu.matmul %16, %17, %cst_14 {dimension_numbers = #tpu.dot_dimension_numbers<[1], [0], [0], [1], [0, 0, 1, 1], [], []>} : vector<8x256xbf16>, vector<256x896xbf16>, vector<8x896xf32> -> vector<8x896xf32>
    %c0_15 = arith.constant 0 : index
    %c0_16 = arith.constant 0 : index
    %19 = vector.load %arg7[%c0_15, %c0_16] : memref<1x896xf32, #tpu.memory_space<vmem>>, vector<1x896xf32>
    %20 = vector.broadcast %19 : vector<1x896xf32> to vector<8x896xf32>
    %21 = arith.addf %18, %20 : vector<8x896xf32>
    %22 = math.tanh %21 : vector<8x896xf32>
    %c0_17 = arith.constant 0 : index
    %c0_18 = arith.constant 0 : index
    %23 = vector.load %arg8[%c0_17, %c0_18] : memref<8x896xf32, #tpu.memory_space<vmem>>, vector<8x896xf32>
    tpu.vector_store %arg8[%c0_17, %c0_18], %22 {strides = array<i32>} : memref<8x896xf32, #tpu.memory_space<vmem>>, vector<8x896xf32>,
    return
  }
  func.func @transform_0(%arg0: i32) -> (i32, i32) {
    %c0_i32 = arith.constant 0 : i32
    %c0_i32_0 = arith.constant 0 : i32
    return %arg0, %c0_i32 : i32, i32
  }
  func.func @transform_1(%arg0: i32) -> (i32, i32) {
    %c0_i32 = arith.constant 0 : i32
    %c0_i32_0 = arith.constant 0 : i32
    %c0_i32_1 = arith.constant 0 : i32
    return %c0_i32, %c0_i32_0 : i32, i32
  }
  func.func @transform_2(%arg0: i32) -> (i32, i32) {
    %c0_i32 = arith.constant 0 : i32
    %c0_i32_0 = arith.constant 0 : i32
    %c0_i32_1 = arith.constant 0 : i32
    return %c0_i32, %c0_i32_0 : i32, i32
  }
  func.func @transform_3(%arg0: i32) -> (i32, i32) {
    %c0_i32 = arith.constant 0 : i32
    %c0_i32_0 = arith.constant 0 : i32
    %c0_i32_1 = arith.constant 0 : i32
    return %c0_i32, %c0_i32_0 : i32, i32
  }
  func.func @transform_4(%arg0: i32) -> (i32, i32) {
    %c0_i32 = arith.constant 0 : i32
    %c0_i32_0 = arith.constant 0 : i32
    %c0_i32_1 = arith.constant 0 : i32
    return %c0_i32, %c0_i32_0 : i32, i32
  }
  func.func @transform_5(%arg0: i32) -> (i32, i32) {
    %c0_i32 = arith.constant 0 : i32
    %c0_i32_0 = arith.constant 0 : i32
    %c0_i32_1 = arith.constant 0 : i32
    return %c0_i32, %c0_i32_0 : i32, i32
  }
  func.func @transform_6(%arg0: i32) -> (i32, i32) {
    %c0_i32 = arith.constant 0 : i32
    %c0_i32_0 = arith.constant 0 : i32
    %c0_i32_1 = arith.constant 0 : i32
    return %c0_i32, %c0_i32_0 : i32, i32
  }
  func.func @transform_7(%arg0: i32) -> (i32, i32) {
    %c0_i32 = arith.constant 0 : i32
    %c0_i32_0 = arith.constant 0 : i32
    return %arg0, %c0_i32 : i32, i32
  }
}

</mosaic_0001>

<bundles_post_ra>
// kernel: generator_forward.1
= control target key start
LH: loop header
LB: loop body
LE: loop exit
PB: predicated region body
PF: predicated region fallthrough
CT: control target
= control target key end

     0   :  { %12 = vsyncpa [#allocation3], 0  ;;  %s5579_s0 = inlined_call_operand.vmem [shape: bf16[24,896], index: 0, kind: input, shape index: {}]   ;;  %s5580_s1 = inlined_call_operand.vmem [shape: bf16[896,256], index: 1, kind: input, shape index: {}]   ;;  %s5581_s2 = inlined_call_operand.vmem [shape: f32[1,256], index: 2, kind: input, shape index: {}]   ;;  %s5582_s3 = inlined_call_operand.vmem [shape: bf16[256,256], index: 3, kind: input, shape index: {}]   ;;  %s5583_s4 = inlined_call_operand.vmem [shape: f32[1,256], index: 4, kind: input, shape index: {}]   ;;  %s5584_s5 = inlined_call_operand.vmem [shape: bf16[256,896], index: 5, kind: input, shape index: {}]   ;;  %s5585_s6 = inlined_call_operand.vmem [shape: f32[1,896], index: 6, kind: input, shape index: {}]   ;;  %s5586_s7 = inlined_call_operand.hbm [shape: f32[24,896], index: 7, kind: output, shape index: {}]  }
   0x1   :  { %14 = vsyncpa [#allocation3 + $0x1], 0  ;;  %s3864_s24 = smov 0   ;;  %s3866_s25 = smov 0  }
   0x2   :  { %s3868_s26 = smov 0   ;;  %s3870_s27 = smov 0  }
   0x3 LB: > { %s3885_s28 = sadd.s32 4294967295, %s3822_s27   ;;  %s2416_s29 = sadd.s32 4294967294, %s3822_s27   ;;  %s3822_s27 = sphi %s3870_s27, %s5592_s27   ;;  %s3818_s26 = sphi %s3868_s26, %s5591_s26   ;;  %s3814_s25 = sphi %s3866_s25, %s5590_s25   ;;  %s3810_s24 = sphi %s3864_s24, %s5589_s24  }
   0x4   : > { %s3889_s30 = sadd.s32 1, %s3822_s27   ;;  %s179_s8 = sadd.s32 1, %s3818_s26 }
   0x5   : > { %s176_s9 = ssub.s32 %s3822_s27, %s3889_s30  ;;  %p189_p0 = scmp.ne.s32.totalorder %s3818_s26, %s3814_s25 }
   0x6   : > { %p177_p1 = scmp.eq.s32.totalorder %s176_s9, 0  ;;  %p190_p2 = scmp.eq.s32.totalorder %s3885_s28, 2 }
   0x7   : > { %p195_p3 = scmp.ne.s32.totalorder %s3814_s25, %s3810_s24  ;;  %p196_p4 = scmp.eq.s32.totalorder %s2416_s29, 2 }
   0x8   : > { %s3900_s10 = scalar_select %p177_p1, %s3818_s26, %s179_s8  }
   0x9   : > { %p3902_p5 = por %p190_p2, %p189_p0  ;;  %p3906_p6 = por %p196_p4, %p195_p3 }
   0xa   : > { %p2419_p7 = scmp.ge.s32.totalorder %s3822_s27, 1  ;;  %p240_p8 = scmp.lt.s32.totalorder %s3822_s27, 4 }
   0xc   : > { %p241_p9 = pnand %p2419_p7, %p240_p8 }
   0xd   : > { %p272_p10 = scmp.lt.s32.totalorder (!%p241_p9), %s3885_s28, 2  ;;  %s269_s18 = sand.u32 (!%p241_p9), 1, %s3814_s25  }
   0xe   : > { %244 = sbr.rel (%p241_p9) target bundleno = 631 (0x277), region = 48  ;;  %s2341_s13 = scalar_lea.sflag (!%p241_p9), [#allocation3], %s269_s18 }
   0xf   : > { %s3704_s19 = smul.u32 (!%p241_p9), 56, %s269_s18  ;;  %s3780_s16 = scalar_lea.hbm (!%p241_p9), %s5586_s7, 168 }
  0x10   : > { %s3706_s22 = smul.u32 (!%p241_p9), 56, %s3885_s28 }
  0x11   : > { %s5531_s21 = scalar_lea.vmem (!%p241_p9), [#allocation2], %s3704_s19 }
  0x12   : > { %s2352_s29 = scalar_lea.hbm (!%p241_p9), %s5586_s7, %s3706_s22  ;;  %s2354_s8 = sshll.u32 (!%p241_p9), %s5531_s21, 4  ;;  %s2355_s8 = int_to_ptr.vmem [resolvable:$true] %s2354_s8 }
  0x13   : > { %v2479_v0 = vld [vmem:[%s5580_s1 + $0x70] sm:$0xf]  ;;  %v3463_v1 = vld [vmem:[%s5580_s1 + $0x74] sm:$0xf0]  ;;  %v2471_v9 = vld [vmem:[%s5580_s1 + $0x60] sm:$0xf] }
  0x14   : > { %v2543_v2 = vld [vmem:[%s5580_s1 + $0xf0] sm:$0xf]  ;;  %v2480_v3 = vor.u32 %v3463_v1, %v2479_v0  ;;  %v3479_v4 = vld [vmem:[%s5580_s1 + $0xf4] sm:$0xf0]  ;;  %v3461_v10 = vld [vmem:[%s5580_s1 + $0x64] sm:$0xf0] }
  0x15   : > { %v2607_v5 = vld [vmem:[%s5580_s1 + $0x170] sm:$0xf]  ;;  %v3495_v6 = vld [vmem:[%s5580_s1 + $0x174] sm:$0xf0]  ;;  %v2544_v7 = vor.u32 %v3479_v4, %v2543_v2  ;;  %v2535_v11 = vld [vmem:[%s5580_s1 + $0xe0] sm:$0xf]  ;;  %v2472_v12 = vor.u32 %v3461_v10, %v2471_v9 }
  0x16   : > { %v2608_v8 = vor.u32 %v3495_v6, %v2607_v5  ;;  %984 = vmatpush.bf16.msra.mxu0 %v2480_v3  ;;  %v3477_v13 = vld [vmem:[%s5580_s1 + $0xe4] sm:$0xf0]  ;;  %v2599_v14 = vld [vmem:[%s5580_s1 + $0x160] sm:$0xf]  ;;  %v2463_v18 = vld [vmem:[%s5580_s1 + $0x50] sm:$0xf] }
  0x17   : > { %v3493_v15 = vld [vmem:[%s5580_s1 + $0x164] sm:$0xf0]  ;;  %997 = vmatpush.bf16.msra.mxu1 %v2544_v7  ;;  %v2536_v16 = vor.u32 %v3477_v13, %v2535_v11  ;;  %v3459_v19 = vld [vmem:[%s5580_s1 + $0x54] sm:$0xf0]  ;;  %v2527_v20 = vld [vmem:[%s5580_s1 + $0xd0] sm:$0xf] }
  0x18   : > { %1010 = vmatpush.bf16.msra.mxu2 %v2608_v8  ;;  %v2600_v17 = vor.u32 %v3493_v15, %v2599_v14  ;;  %v3475_v21 = vld [vmem:[%s5580_s1 + $0xd4] sm:$0xf0]  ;;  %v2591_v22 = vld [vmem:[%s5580_s1 + $0x150] sm:$0xf]  ;;  %v2464_v24 = vor.u32 %v3459_v19, %v2463_v18  ;;  %v2455_v25 = vld [vmem:[%s5580_s1 + $0x40] sm:$0xf] }
  0x19   : > { %v3491_v23 = vld [vmem:[%s5580_s1 + $0x154] sm:$0xf0]  ;;  %v3457_v26 = vld [vmem:[%s5580_s1 + $0x44] sm:$0xf0]  ;;  %v2528_v27 = vor.u32 %v3475_v21, %v2527_v20  ;;  %v2519_v29 = vld [vmem:[%s5580_s1 + $0xc0] sm:$0xf] }
  0x1a   : > { %985 = vmatpush.bf16.msra.mxu0 %v2472_v12  ;;  %v2592_v28 = vor.u32 %v3491_v23, %v2591_v22  ;;  %v2671_v30 = vld [vmem:[%s5580_s1 + $0x1f0] sm:$0xf]  ;;  %v3511_v31 = vld [vmem:[%s5580_s1 + $0x1f4] sm:$0xf0]  ;;  %v3473_v32 = vld [vmem:[%s5580_s1 + $0xc4] sm:$0xf0]  ;;  %v2456_v37 = vor.u32 %v3457_v26, %v2455_v25 }
  0x1b   : > { %998 = vmatpush.bf16.msra.mxu1 %v2536_v16  ;;  %v2583_v33 = vld [vmem:[%s5580_s1 + $0x140] sm:$0xf]  ;;  %v3489_v34 = vld [vmem:[%s5580_s1 + $0x144] sm:$0xf0]  ;;  %v2672_v35 = vor.u32 %v3511_v31, %v2671_v30  ;;  %v2447_v38 = vld [vmem:[%s5580_s1 + $0x30] sm:$0xf]  ;;  %v2520_v41 = vor.u32 %v3473_v32, %v2519_v29 }
  0x1c   : > { %1011 = vmatpush.bf16.msra.mxu2 %v2600_v17  ;;  %v2663_v36 = vld [vmem:[%s5580_s1 + $0x1e0] sm:$0xf]  ;;  %v3455_v39 = vld [vmem:[%s5580_s1 + $0x34] sm:$0xf0]  ;;  %v3509_v40 = vld [vmem:[%s5580_s1 + $0x1e4] sm:$0xf0]  ;;  %v2584_v42 = vor.u32 %v3489_v34, %v2583_v33 }
  0x1d   : > { %1023 = vmatpush.bf16.msra.mxu3 %v2672_v35  ;;  %v2511_v43 = vld [vmem:[%s5580_s1 + $0xb0] sm:$0xf]  ;;  %v3471_v44 = vld [vmem:[%s5580_s1 + $0xb4] sm:$0xf0]  ;;  %v2664_v46 = vor.u32 %v3509_v40, %v2663_v36  ;;  %v2448_v50 = vor.u32 %v3455_v39, %v2447_v38  ;;  %v2439_v51 = vld [vmem:[%s5580_s1 + $0x20] sm:$0xf] }
  0x1e   : > { %986 = vmatpush.bf16.msra.mxu0 %v2464_v24  ;;  %v2575_v45 = vld [vmem:[%s5580_s1 + $0x130] sm:$0xf]  ;;  %v3487_v47 = vld [vmem:[%s5580_s1 + $0x134] sm:$0xf0]  ;;  %v3453_v52 = vld [vmem:[%s5580_s1 + $0x24] sm:$0xf0]  ;;  %v2512_v54 = vor.u32 %v3471_v44, %v2511_v43 }
  0x1f   : > { %999 = vmatpush.bf16.msra.mxu1 %v2528_v27  ;;  %v2655_v48 = vld [vmem:[%s5580_s1 + $0x1d0] sm:$0xf]  ;;  %v3507_v49 = vld [vmem:[%s5580_s1 + $0x1d4] sm:$0xf0]  ;;  %v2576_v55 = vor.u32 %v3487_v47, %v2575_v45  ;;  %v2503_v56 = vld [vmem:[%s5580_s1 + $0xa0] sm:$0xf]  ;;  %v2440_v62 = vor.u32 %v3453_v52, %v2439_v51 }
  0x20   : > { %1012 = vmatpush.bf16.msra.mxu2 %v2592_v28  ;;  %v2656_v53 = vor.u32 %v3507_v49, %v2655_v48  ;;  %v2647_v57 = vld [vmem:[%s5580_s1 + $0x1c0] sm:$0xf]  ;;  %v3505_v58 = vld [vmem:[%s5580_s1 + $0x1c4] sm:$0xf0]  ;;  %v2431_v63 = vld [vmem:[%s5580_s1 + $0x10] sm:$0xf] }
  0x21   : > { %1024 = vmatpush.bf16.msra.mxu3 %v2664_v46  ;;  %v3469_v59 = vld [vmem:[%s5580_s1 + $0xa4] sm:$0xf0]  ;;  %v2567_v60 = vld [vmem:[%s5580_s1 + $0x120] sm:$0xf]  ;;  %v3451_v0 = vld [vmem:[%s5580_s1 + $0x14] sm:$0xf0]  ;;  %v2648_v1 = vor.u32 %v3505_v58, %v2647_v57 }
  0x22   : > { %987 = vmatpush.bf16.msra.mxu0 %v2456_v37  ;;  %v3485_v61 = vld [vmem:[%s5580_s1 + $0x124] sm:$0xf0]  ;;  %v2504_v2 = vor.u32 %v3469_v59, %v2503_v56  ;;  %v2495_v4 = vld [vmem:[%s5580_s1 + $0x90] sm:$0xf]  ;;  %v3503_v6 = vld [vmem:[%s5580_s1 + $0x1b4] sm:$0xf0]  ;;  %v2432_v10 = vor.u32 %v3451_v0, %v2431_v63 }
  0x23   : > { %1000 = vmatpush.bf16.msra.mxu1 %v2520_v41  ;;  %v2568_v3 = vor.u32 %v3485_v61, %v2567_v60  ;;  %v2639_v5 = vld [vmem:[%s5580_s1 + $0x1b0] sm:$0xf]  ;;  %v3467_v7 = vld [vmem:[%s5580_s1 + $0x94] sm:$0xf0]  ;;  %v2423_v11 = vld [vmem:[%s5580_s1] sm:$0xf] }
  0x24   : > { %1013 = vmatpush.bf16.msra.mxu2 %v2584_v42  ;;  %v2559_v8 = vld [vmem:[%s5580_s1 + $0x110] sm:$0xf]  ;;  %v3483_v9 = vld [vmem:[%s5580_s1 + $0x114] sm:$0xf0]  ;;  %v3449_v12 = vld [vmem:[%s5580_s1 + $0x4] sm:$0xf0]  ;;  %v2640_v14 = vor.u32 %v3503_v6, %v2639_v5  ;;  %v2496_v15 = vor.u32 %v3467_v7, %v2495_v4 }
  0x25   : > { %1025 = vmatpush.bf16.msra.mxu3 %v2656_v53  ;;  %v2487_v13 = vld [vmem:[%s5580_s1 + $0x80] sm:$0xf]  ;;  %v2560_v16 = vor.u32 %v3483_v9, %v2559_v8  ;;  %v3465_v17 = vld [vmem:[%s5580_s1 + $0x84] sm:$0xf0]  ;;  %v2735_v22 = vld [vmem:[%s5580_s1 + $0x270] sm:$0xf]  ;;  %v2424_v26 = vor.u32 %v3449_v12, %v2423_v11 }
  0x26   : > { %988 = vmatpush.bf16.msra.mxu0 %v2448_v50  ;;  %v2631_v18 = vld [vmem:[%s5580_s1 + $0x1a0] sm:$0xf]  ;;  %v3501_v19 = vld [vmem:[%s5580_s1 + $0x1a4] sm:$0xf0]  ;;  %v3527_v23 = vld [vmem:[%s5580_s1 + $0x274] sm:$0xf0]  ;;  %v2488_v30 = vor.u32 %v3465_v17, %v2487_v13 }
  0x27   : > { %1001 = vmatpush.bf16.msra.mxu1 %v2512_v54  ;;  %v2551_v20 = vld [vmem:[%s5580_s1 + $0x100] sm:$0xf]  ;;  %v3481_v21 = vld [vmem:[%s5580_s1 + $0x104] sm:$0xf0]  ;;  %v2799_v24 = vld [vmem:[%s5580_s1 + $0x2f0] sm:$0xf]  ;;  %v2632_v29 = vor.u32 %v3501_v19, %v2631_v18  ;;  %v2736_v34 = vor.u32 %v3527_v23, %v2735_v22 }
  0x28   : > { %1014 = vmatpush.bf16.msra.mxu2 %v2576_v55  ;;  %v3543_v25 = vld [vmem:[%s5580_s1 + $0x2f4] sm:$0xf0]  ;;  %v2863_v27 = vld [vmem:[%s5580_s1 + $0x370] sm:$0xf]  ;;  %v2552_v31 = vor.u32 %v3481_v21, %v2551_v20  ;;  %v2727_v36 = vld [vmem:[%s5580_s1 + $0x260] sm:$0xf] }
  0x29   : > { %1026 = vmatpush.bf16.msra.mxu3 %v2648_v1  ;;  %v3559_v28 = vld [vmem:[%s5580_s1 + $0x374] sm:$0xf0]  ;;  %v2623_v32 = vld [vmem:[%s5580_s1 + $0x190] sm:$0xf]  ;;  %v2800_v35 = vor.u32 %v3543_v25, %v2799_v24  ;;  %v3525_v37 = vld [vmem:[%s5580_s1 + $0x264] sm:$0xf0] }
  0x2a   : > { %989 = vmatpush.bf16.msra.mxu0 %v2440_v62  ;;  %v3499_v33 = vld [vmem:[%s5580_s1 + $0x194] sm:$0xf0]  ;;  %v2864_v38 = vor.u32 %v3559_v28, %v2863_v27  ;;  %v2791_v39 = vld [vmem:[%s5580_s1 + $0x2e0] sm:$0xf]  ;;  %v3541_v40 = vld [vmem:[%s5580_s1 + $0x2e4] sm:$0xf0]  ;;  %v2728_v49 = vor.u32 %v3525_v37, %v2727_v36 }
  0x2b   : > { %1002 = vmatpush.bf16.msra.mxu1 %v2504_v2  ;;  %v2855_v41 = vld [vmem:[%s5580_s1 + $0x360] sm:$0xf]  ;;  %v3557_v42 = vld [vmem:[%s5580_s1 + $0x364] sm:$0xf0]  ;;  %v2624_v43 = vor.u32 %v3499_v33, %v2623_v32  ;;  %v2719_v44 = vld [vmem:[%s5580_s1 + $0x250] sm:$0xf]  ;;  %v2792_v50 = vor.u32 %v3541_v40, %v2791_v39 }
  0x2c   : > { %1015 = vmatpush.bf16.msra.mxu2 %v2568_v3  ;;  %v3523_v45 = vld [vmem:[%s5580_s1 + $0x254] sm:$0xf0]  ;;  %v2783_v46 = vld [vmem:[%s5580_s1 + $0x2d0] sm:$0xf]  ;;  %v2615_v47 = vld [vmem:[%s5580_s1 + $0x180] sm:$0xf]  ;;  %v2856_v54 = vor.u32 %v3557_v42, %v2855_v41 }
  0x2d   : > { %1027 = vmatpush.bf16.msra.mxu3 %v2640_v14  ;;  %v3497_v48 = vld [vmem:[%s5580_s1 + $0x184] sm:$0xf0]  ;;  %s273_s17 = scalar_select %p272_p10, %s3885_s28, 2  ;;  %v3539_v51 = vld [vmem:[%s5580_s1 + $0x2d4] sm:$0xf0]  ;;  %v2720_v61 = vor.u32 %v3523_v45, %v2719_v44 }
  0x2e   : > { %990 = vmatpush.bf16.msra.mxu0 %v2432_v10  ;;  %v3462_v52 = vld [vmem:[%s5580_s1 + $0x74] sm:$0xf]  ;;  %v2481_v53 = vld [vmem:[%s5580_s1 + $0x78] sm:$0xf0]  ;;  %v2847_v55 = vld [vmem:[%s5580_s1 + $0x350] sm:$0xf]  ;;  %v2616_v57 = vor.u32 %v3497_v48, %v2615_v47  ;;  %v2784_v62 = vor.u32 %v3539_v51, %v2783_v46 }
  0x2f   : > { %1003 = vmatpush.bf16.msra.mxu1 %v2496_v15  ;;  %v3555_v56 = vld [vmem:[%s5580_s1 + $0x354] sm:$0xf0]  ;;  %s3705_s14 = smul.u32 28, %s273_s17  ;;  %v2711_v58 = vld [vmem:[%s5580_s1 + $0x240] sm:$0xf]  ;;  %v2484_v59 = vor.u32 %v3462_v52, %v2481_v53  ;;  %s2356_s9 = sshll.u32 %s2352_s29, 4  ;;  %s2357_s9 = int_to_ptr.hbm [resolvable:$true] %s2356_s9 }
  0x30   : > { %1016 = vmatpush.bf16.msra.mxu2 %v2560_v16  ;;  %v3460_v60 = vld [vmem:[%s5580_s1 + $0x64] sm:$0xf]  ;;  %v2848_v63 = vor.u32 %v3555_v56, %v2847_v55  ;;  %v2473_v2 = vld [vmem:[%s5580_s1 + $0x68] sm:$0xf0]  ;;  %v3521_v3 = vld [vmem:[%s5580_s1 + $0x244] sm:$0xf0] }
  0x31   : > { %1028 = vmatpush.bf16.msra.mxu3 %v2632_v29  ;;  %s4172_s20 = scalar_lea.vmem %s5579_s0, %s3705_s14  ;;  %v2775_v4 = vld [vmem:[%s5580_s1 + $0x2c0] sm:$0xf]  ;;  %v3537_v5 = vld [vmem:[%s5580_s1 + $0x2c4] sm:$0xf0]  ;;  %v2476_v14 = vor.u32 %v3460_v60, %v2473_v2  ;;  %v2712_v16 = vor.u32 %v3521_v3, %v2711_v58  ;;  %v2703_v18 = vld [vmem:[%s5580_s1 + $0x230] sm:$0xf] }
  0x32   : > { %991 = vmatpush.bf16.msra.mxu0 %v2424_v26  ;;  %v278_v0 = vld [vmem:[%s4172_s20 + $0x8] sm:$0xff]  ;;  %v277_v1 = vld [vmem:[%s4172_s20] sm:$0xff]  ;;  %v2776_v17 = vor.u32 %v3537_v5, %v2775_v4  ;;  %v3458_v19 = vld [vmem:[%s5580_s1 + $0x54] sm:$0xf] }
  0x33   : > { %1004 = vmatpush.bf16.msra.mxu1 %v2488_v30  ;;  %v405_v6 = vunpack.c.l.b16 %v278_v0  ;;  %v403_v7 = vunpack.c.l.b16 %v277_v1  ;;  %v404_v8 = vunpack.c.h.b16 %v277_v1  ;;  %v406_v9 = vunpack.c.h.b16 %v278_v0  ;;  %v2839_v10 = vld [vmem:[%s5580_s1 + $0x340] sm:$0xf]  ;;  %v3553_v11 = vld [vmem:[%s5580_s1 + $0x344] sm:$0xf0]  ;;  %v2465_v20 = vld [vmem:[%s5580_s1 + $0x58] sm:$0xf0] }
  0x34   : > { %1017 = vmatpush.bf16.msra.mxu2 %v2552_v31  ;;  %v2840_v21 = vor.u32 %v3553_v11, %v2839_v10  ;;  %v3519_v22 = vld [vmem:[%s5580_s1 + $0x234] sm:$0xf0]  ;;  %v2767_v23 = vld [vmem:[%s5580_s1 + $0x2b0] sm:$0xf]  ;;  %v2468_v28 = vor.u32 %v3458_v19, %v2465_v20  ;;  %v2695_v31 = vld [vmem:[%s5580_s1 + $0x220] sm:$0xf] }
  0x35   : > { %1029 = vmatpush.bf16.msra.mxu3 %v2624_v43  ;;  %v4197_v12 = vpack.c.b16 %v405_v6, %v405_v6  ;;  %v4199_v13 = vpack.c.b16 %v403_v7, %v403_v7  ;;  %v4201_v15 = vpack.c.b16 %v404_v8, %v404_v8  ;;  %v3535_v24 = vld [vmem:[%s5580_s1 + $0x2b4] sm:$0xf0]  ;;  %v4222_v25 = vpack.c.b16 %v406_v9, %v406_v9  ;;  %v2831_v26 = vld [vmem:[%s5580_s1 + $0x330] sm:$0xf]  ;;  %v3456_v32 = vld [vmem:[%s5580_s1 + $0x44] sm:$0xf] }
  0x36   : > { %1036 = vmatpush.bf16.msrb.mxu0 %v2736_v34  ;;  %v3551_v27 = vld [vmem:[%s5580_s1 + $0x334] sm:$0xf0]  ;;  %v2704_v29 = vor.u32 %v3519_v22, %v2703_v18  ;;  %v2768_v30 = vor.u32 %v3535_v24, %v2767_v23  ;;  %v2457_v33 = vld [vmem:[%s5580_s1 + $0x48] sm:$0xf0]  ;;  %v2759_v36 = vld [vmem:[%s5580_s1 + $0x2a0] sm:$0xf] }
  0x37   : > { %1049 = vmatpush.bf16.msrb.mxu1 %v2800_v35  ;;  %992 = vmatmul.bf16.vlgmr.msra.gmra.mxu0 %v4199_v13  ;;  %v2832_v34 = vor.u32 %v3551_v27, %v2831_v26  ;;  %v3517_v35 = vld [vmem:[%s5580_s1 + $0x224] sm:$0xf0]  ;;  %v2460_v40 = vor.u32 %v3456_v32, %v2457_v33  ;;  %v2687_v43 = vld [vmem:[%s5580_s1 + $0x210] sm:$0xf]  ;;  %v3454_v44 = vld [vmem:[%s5580_s1 + $0x34] sm:$0xf] }
  0x38   : > { %1062 = vmatpush.bf16.msrb.mxu2 %v2864_v38  ;;  %1005 = vmatmul.bf16.vlgmr.msra.gmra.mxu1 %v4201_v15  ;;  %v3533_v37 = vld [vmem:[%s5580_s1 + $0x2a4] sm:$0xf0]  ;;  %v2823_v38 = vld [vmem:[%s5580_s1 + $0x320] sm:$0xf]  ;;  %v2696_v41 = vor.u32 %v3517_v35, %v2695_v31  ;;  %v2449_v45 = vld [vmem:[%s5580_s1 + $0x38] sm:$0xf0] }
  0x39   : > { %1030 = vmatpush.bf16.msra.mxu3 %v2616_v57  ;;  %1018 = vmatmul.bf16.vlgmr.msra.gmra.mxu2 %v4197_v12  ;;  %v3549_v39 = vld [vmem:[%s5580_s1 + $0x324] sm:$0xf0]  ;;  %v2760_v42 = vor.u32 %v3533_v37, %v2759_v36  ;;  %v3515_v47 = vld [vmem:[%s5580_s1 + $0x214] sm:$0xf0]  ;;  %v2751_v48 = vld [vmem:[%s5580_s1 + $0x290] sm:$0xf]  ;;  %v2452_v56 = vor.u32 %v3454_v44, %v2449_v45 }
  0x3a   : > { %1037 = vmatpush.bf16.msrb.mxu0 %v2728_v49  ;;  %v2824_v46 = vor.u32 %v3549_v39, %v2823_v38  ;;  %v3531_v49 = vld [vmem:[%s5580_s1 + $0x294] sm:$0xf0]  ;;  %v2679_v52 = vld [vmem:[%s5580_s1 + $0x200] sm:$0xf]  ;;  %v3513_v53 = vld [vmem:[%s5580_s1 + $0x204] sm:$0xf0]  ;;  %v2688_v57 = vor.u32 %v3515_v47, %v2687_v43 }
  0x3b   : > { %1050 = vmatpush.bf16.msrb.mxu1 %v2792_v50  ;;  %v2815_v50 = vld [vmem:[%s5580_s1 + $0x310] sm:$0xf]  ;;  %v3547_v51 = vld [vmem:[%s5580_s1 + $0x314] sm:$0xf0]  ;;  %v3529_v55 = vld [vmem:[%s5580_s1 + $0x284] sm:$0xf0]  ;;  %v2752_v58 = vor.u32 %v3531_v49, %v2751_v48  ;;  %v2680_v11 = vor.u32 %v3513_v53, %v2679_v52 }
  0x3c   : > { %1063 = vmatpush.bf16.msrb.mxu2 %v2856_v54  ;;  %1031 = vmatmul.bf16.vlgmr.msra.gmra.mxu3 %v4222_v25  ;;  %v2743_v54 = vld [vmem:[%s5580_s1 + $0x280] sm:$0xf]  ;;  %v3452_v60 = vld [vmem:[%s5580_s1 + $0x24] sm:$0xf]  ;;  %v3545_v0 = vld [vmem:[%s5580_s1 + $0x304] sm:$0xf0] }
  0x3d   : > { %1075 = vmatpush.bf16.msrb.mxu3 %v2484_v59  ;;  %v279_v59 = vld [vmem:[%s4172_s20 + $0x10] sm:$0xff]  ;;  %v280_v1 = vld [vmem:[%s4172_s20 + $0x18] sm:$0xf]  ;;  %v2545_v3 = vld [vmem:[%s5580_s1 + $0xf8] sm:$0xf0]  ;;  %s3774_s20 = sshra.s32 %s2357_s9, 4  ;;  %s3775_s20 = int_to_ptr.hbm [resolvable:$true] %s3774_s20 }
  0x3e   : > { %1038 = vmatpush.bf16.msrb.mxu0 %v2720_v61  ;;  %v2441_v61 = vld [vmem:[%s5580_s1 + $0x28] sm:$0xf0]  ;;  %v3478_v2 = vld [vmem:[%s5580_s1 + $0xf4] sm:$0xf]  ;;  %v2609_v5 = vld [vmem:[%s5580_s1 + $0x178] sm:$0xf0]  ;;  %v407_v6 = vunpack.c.l.b16 %v279_v59  ;;  %v408_v8 = vunpack.c.h.b16 %v279_v59  ;;  %p3781_p0 = scmp.lt.s32.totalorder %s3775_s20, %s5586_s7 }
  0x3f   : > { %1051 = vmatpush.bf16.msrb.mxu1 %v2784_v62  ;;  %v2816_v62 = vor.u32 %v3547_v51, %v2815_v50  ;;  %v3494_v4 = vld [vmem:[%s5580_s1 + $0x174] sm:$0xf]  ;;  %v2444_v7 = vor.u32 %v3452_v60, %v2441_v61  ;;  %v2673_v10 = vld [vmem:[%s5580_s1 + $0x1f8] sm:$0xf0]  ;;  %v2548_v18 = vor.u32 %v3478_v2, %v2545_v3  ;;  %v3476_v22 = vld [vmem:[%s5580_s1 + $0xe4] sm:$0xf] }
  0x40   : > { %1064 = vmatpush.bf16.msrb.mxu2 %v2848_v63  ;;  %v2807_v63 = vld [vmem:[%s5580_s1 + $0x300] sm:$0xf]  ;;  %v3510_v9 = vld [vmem:[%s5580_s1 + $0x1f4] sm:$0xf]  ;;  %v2433_v20 = vld [vmem:[%s5580_s1 + $0x18] sm:$0xf0]  ;;  %v4340_v27 = vpack.c.b16 %v407_v6, %v407_v6 }
  0x41   : > { %1076 = vmatpush.bf16.msrb.mxu3 %v2476_v14  ;;  %v2744_v14 = vor.u32 %v3529_v55, %v2743_v54  ;;  %v3450_v19 = vld [vmem:[%s5580_s1 + $0x14] sm:$0xf]  ;;  %v2537_v23 = vld [vmem:[%s5580_s1 + $0xe8] sm:$0xf0]  ;;  %v3492_v24 = vld [vmem:[%s5580_s1 + $0x164] sm:$0xf]  ;;  %v2676_v26 = vor.u32 %v3510_v9, %v2673_v10 }
  0x42   : > { %1039 = vmatpush.bf16.msrb.mxu0 %v2712_v16  ;;  %v409_v16 = vunpack.c.l.b16 %v280_v1  ;;  %v2665_v31 = vld [vmem:[%s5580_s1 + $0x1e8] sm:$0xf0]  ;;  %v2436_v33 = vor.u32 %v3450_v19, %v2433_v20  ;;  %v2540_v35 = vor.u32 %v3476_v22, %v2537_v23  ;;  %v2529_v36 = vld [vmem:[%s5580_s1 + $0xd8] sm:$0xf0]  ;;  %v3448_v37 = vld [vmem:[%s5580_s1 + $0x4] sm:$0xf] }
  0x43   : > { %1052 = vmatpush.bf16.msrb.mxu1 %v2776_v17  ;;  %v2808_v17 = vor.u32 %v3545_v0, %v2807_v63  ;;  %v2425_v38 = vld [vmem:[%s5580_s1 + $0x8] sm:$0xf0]  ;;  %v2593_v44 = vld [vmem:[%s5580_s1 + $0x158] sm:$0xf0]  ;;  %v3506_v45 = vld [vmem:[%s5580_s1 + $0x1d4] sm:$0xf] }
  0x44   : > { %1065 = vmatpush.bf16.msrb.mxu2 %v2840_v21  ;;  %v2612_v21 = vor.u32 %v3494_v4, %v2609_v5  ;;  %v4353_v32 = vpack.c.b16 %v409_v16, %v409_v16  ;;  %v2428_v47 = vor.u32 %v3448_v37, %v2425_v38  ;;  %v3472_v49 = vld [vmem:[%s5580_s1 + $0xc4] sm:$0xf]  ;;  %v2521_v50 = vld [vmem:[%s5580_s1 + $0xc8] sm:$0xf0]  ;;  %v3470_v61 = vld [vmem:[%s5580_s1 + $0xb4] sm:$0xf] }
  0x45   : > { %1077 = vmatpush.bf16.msrb.mxu3 %v2468_v28  ;;  %v2601_v28 = vld [vmem:[%s5580_s1 + $0x168] sm:$0xf0]  ;;  %v3488_v53 = vld [vmem:[%s5580_s1 + $0x144] sm:$0xf]  ;;  %v2524_v60 = vor.u32 %v3472_v49, %v2521_v50  ;;  %v3486_v1 = vld [vmem:[%s5580_s1 + $0x134] sm:$0xf] }
  0x46   : > { %1040 = vmatpush.bf16.msrb.mxu0 %v2704_v29  ;;  %v4345_v29 = vpack.c.b16 %v408_v8, %v408_v8  ;;  %v2604_v39 = vor.u32 %v3492_v24, %v2601_v28  ;;  %v3524_v54 = vld [vmem:[%s5580_s1 + $0x264] sm:$0xf]  ;;  %v2729_v55 = vld [vmem:[%s5580_s1 + $0x268] sm:$0xf0]  ;;  %v3522_v2 = vld [vmem:[%s5580_s1 + $0x254] sm:$0xf] }
  0x47   : > { %1053 = vmatpush.bf16.msrb.mxu1 %v2768_v30  ;;  %v3508_v30 = vld [vmem:[%s5580_s1 + $0x1e4] sm:$0xf]  ;;  %v2649_v59 = vld [vmem:[%s5580_s1 + $0x1c8] sm:$0xf0]  ;;  %v2732_v63 = vor.u32 %v3524_v54, %v2729_v55  ;;  %v2721_v3 = vld [vmem:[%s5580_s1 + $0x258] sm:$0xf0] }
  0x48   : > { %1066 = vmatpush.bf16.msrb.mxu2 %v2832_v34  ;;  %v3474_v34 = vld [vmem:[%s5580_s1 + $0xd4] sm:$0xf]  ;;  %v2668_v43 = vor.u32 %v3508_v30, %v2665_v31  ;;  %v2577_v5 = vld [vmem:[%s5580_s1 + $0x138] sm:$0xf0]  ;;  %v3468_v9 = vld [vmem:[%s5580_s1 + $0xa4] sm:$0xf] }
  0x49   : > { %1078 = vmatpush.bf16.msrb.mxu3 %v2460_v40  ;;  %v3490_v40 = vld [vmem:[%s5580_s1 + $0x154] sm:$0xf]  ;;  %v2532_v48 = vor.u32 %v3474_v34, %v2529_v36  ;;  %v2505_v10 = vld [vmem:[%s5580_s1 + $0xa8] sm:$0xf0]  ;;  %v3484_v16 = vld [vmem:[%s5580_s1 + $0x124] sm:$0xf] }
  0x4a   : > { %1041 = vmatpush.bf16.msrb.mxu0 %v2696_v41  ;;  %v3526_v41 = vld [vmem:[%s5580_s1 + $0x274] sm:$0xf]  ;;  %v2596_v52 = vor.u32 %v3490_v40, %v2593_v44  ;;  %v2569_v19 = vld [vmem:[%s5580_s1 + $0x128] sm:$0xf0]  ;;  %v3500_v20 = vld [vmem:[%s5580_s1 + $0x1a4] sm:$0xf]  ;;  %v2508_v22 = vor.u32 %v3468_v9, %v2505_v10 }
  0x4b   : > { %1054 = vmatpush.bf16.msrb.mxu1 %v2760_v42  ;;  %v2737_v42 = vld [vmem:[%s5580_s1 + $0x278] sm:$0xf0]  ;;  %v3502_v6 = vld [vmem:[%s5580_s1 + $0x1b4] sm:$0xf]  ;;  %v2572_v28 = vor.u32 %v3484_v16, %v2569_v19  ;;  %v2489_v40 = vld [vmem:[%s5580_s1 + $0x88] sm:$0xf0] }
  0x4c   : > { %1067 = vmatpush.bf16.msrb.mxu2 %v2824_v46  ;;  %v2657_v46 = vld [vmem:[%s5580_s1 + $0x1d8] sm:$0xf0]  ;;  %v2740_v51 = vor.u32 %v3526_v41, %v2737_v42  ;;  %v3466_v23 = vld [vmem:[%s5580_s1 + $0x94] sm:$0xf]  ;;  %v3480_v41 = vld [vmem:[%s5580_s1 + $0x104] sm:$0xf] }
  0x4d   : > { %1079 = vmatpush.bf16.msrb.mxu3 %v2452_v56  ;;  %v2660_v56 = vor.u32 %v3506_v45, %v2657_v46  ;;  %v2497_v24 = vld [vmem:[%s5580_s1 + $0x98] sm:$0xf0]  ;;  %v3482_v30 = vld [vmem:[%s5580_s1 + $0x114] sm:$0xf]  ;;  %v2553_v44 = vld [vmem:[%s5580_s1 + $0x108] sm:$0xf0] }
  0x4e   : > { %1042 = vmatpush.bf16.msrb.mxu0 %v2688_v57  ;;  %v2585_v57 = vld [vmem:[%s5580_s1 + $0x148] sm:$0xf0]  ;;  %v3518_v31 = vld [vmem:[%s5580_s1 + $0x234] sm:$0xf]  ;;  %v2625_v37 = vld [vmem:[%s5580_s1 + $0x198] sm:$0xf0]  ;;  %v2500_v38 = vor.u32 %v3466_v23, %v2497_v24 }
  0x4f   : > { %1055 = vmatpush.bf16.msrb.mxu1 %v2752_v58  ;;  %v3504_v58 = vld [vmem:[%s5580_s1 + $0x1c4] sm:$0xf]  ;;  %v2588_v0 = vor.u32 %v3488_v53, %v2585_v57  ;;  %v3498_v36 = vld [vmem:[%s5580_s1 + $0x194] sm:$0xf]  ;;  %v2697_v46 = vld [vmem:[%s5580_s1 + $0x228] sm:$0xf0] }
  0x50   : > { %1068 = vmatpush.bf16.msrb.mxu2 %v2816_v62  ;;  %v2513_v62 = vld [vmem:[%s5580_s1 + $0xb8] sm:$0xf0]  ;;  %v2652_v4 = vor.u32 %v3504_v58, %v2649_v59  ;;  %v3516_v45 = vld [vmem:[%s5580_s1 + $0x224] sm:$0xf]  ;;  %v3558_v50 = vld [vmem:[%s5580_s1 + $0x374] sm:$0xf] }
  0x51   : > { %1080 = vmatpush.bf16.msrb.mxu3 %v2444_v7  ;;  %v2641_v7 = vld [vmem:[%s5580_s1 + $0x1b8] sm:$0xf0]  ;;  %v2516_v8 = vor.u32 %v3470_v61, %v2513_v62  ;;  %v2617_v53 = vld [vmem:[%s5580_s1 + $0x188] sm:$0xf0]  ;;  %v2700_v55 = vor.u32 %v3516_v45, %v2697_v46  ;;  %v3514_v58 = vld [vmem:[%s5580_s1 + $0x214] sm:$0xf] }
  0x52   : > { %1043 = vmatpush.bf16.msrb.mxu0 %v2680_v11  ;;  %v2724_v11 = vor.u32 %v3522_v2, %v2721_v3  ;;  %v2801_v49 = vld [vmem:[%s5580_s1 + $0x2f8] sm:$0xf0]  ;;  %v3540_v61 = vld [vmem:[%s5580_s1 + $0x2e4] sm:$0xf]  ;;  %v2793_v62 = vld [vmem:[%s5580_s1 + $0x2e8] sm:$0xf0] }
  0x53   : > { %1056 = vmatpush.bf16.msrb.mxu1 %v2744_v14  ;;  %v2580_v14 = vor.u32 %v3486_v1, %v2577_v5  ;;  %v2689_v59 = vld [vmem:[%s5580_s1 + $0x218] sm:$0xf0]  ;;  %v2857_v1 = vld [vmem:[%s5580_s1 + $0x368] sm:$0xf0]  ;;  %v3512_v3 = vld [vmem:[%s5580_s1 + $0x204] sm:$0xf] }
  0x54   : > { %1069 = vmatpush.bf16.msrb.mxu2 %v2808_v17  ;;  %v2713_v17 = vld [vmem:[%s5580_s1 + $0x248] sm:$0xf0]  ;;  %v2692_v2 = vor.u32 %v3514_v58, %v2689_v59  ;;  %v3538_v9 = vld [vmem:[%s5580_s1 + $0x2d4] sm:$0xf]  ;;  %v2785_v10 = vld [vmem:[%s5580_s1 + $0x2d8] sm:$0xf0] }
  0x55   : > { %1044 = vmatmul.bf16.vlgmr.msrb.gmra.mxu0 %v4340_v27  ;;  %1081 = vmatpush.bf16.msrb.mxu3 %v2436_v33  ;;  %v2705_v33 = vld [vmem:[%s5580_s1 + $0x238] sm:$0xf0]  ;;  %v2681_v5 = vld [vmem:[%s5580_s1 + $0x208] sm:$0xf0]  ;;  %v3550_v24 = vld [vmem:[%s5580_s1 + $0x334] sm:$0xf] }
  0x56   : > { %1088 = vmatpush.bf16.msra.mxu0 %v2548_v18  ;;  %1057 = vmatmul.bf16.vlgmr.msrb.gmra.mxu1 %v4345_v29  ;;  %v2644_v18 = vor.u32 %v3502_v6, %v2641_v7  ;;  %v2708_v42 = vor.u32 %v3518_v31, %v2705_v33  ;;  %v2927_v6 = vld [vmem:[%s5582_s3 + $0x70] sm:$0xf]  ;;  %v3575_v7 = vld [vmem:[%s5582_s3 + $0x74] sm:$0xf0]  ;;  %v2849_v16 = vld [vmem:[%s5580_s1 + $0x358] sm:$0xf0] }
  0x57   : > { %1101 = vmatpush.bf16.msra.mxu1 %v2612_v21  ;;  %1070 = vmatmul.bf16.vlgmr.msrb.gmra.mxu2 %v4353_v32  ;;  %v2633_v21 = vld [vmem:[%s5580_s1 + $0x1a8] sm:$0xf0]  ;;  %v2769_v23 = vld [vmem:[%s5580_s1 + $0x2b8] sm:$0xf0]  ;;  %v3532_v31 = vld [vmem:[%s5580_s1 + $0x2a4] sm:$0xf] }
  0x58   : > { %1114 = vmatpush.bf16.msra.mxu2 %v2676_v26  ;;  %v2636_v34 = vor.u32 %v3500_v20, %v2633_v21  ;;  %v2777_v19 = vld [vmem:[%s5580_s1 + $0x2c8] sm:$0xf0]  ;;  %v3548_v33 = vld [vmem:[%s5580_s1 + $0x324] sm:$0xf]  ;;  %v3570_v58 = vld [vmem:[%s5582_s3 + $0x54] sm:$0xf] }
  0x59   : > { %1082 = vmatpush.bf16.msrb.mxu3 %v2428_v47  ;;  %v2628_v47 = vor.u32 %v3498_v36, %v2625_v37  ;;  %v2841_v20 = vld [vmem:[%s5580_s1 + $0x348] sm:$0xf0]  ;;  %v3530_v37 = vld [vmem:[%s5580_s1 + $0x294] sm:$0xf]  ;;  %v3544_v45 = vld [vmem:[%s5580_s1 + $0x304] sm:$0xf] }
  0x5a   : > { %1089 = vmatpush.bf16.msra.mxu0 %v2540_v35  ;;  %v2561_v35 = vld [vmem:[%s5580_s1 + $0x118] sm:$0xf0]  ;;  %v2809_v46 = vld [vmem:[%s5580_s1 + $0x308] sm:$0xf0]  ;;  %s3776_s28 = scalar_lea.hbm %s3775_s20, 56 }
  0x5b   : > { %1102 = vmatpush.bf16.msra.mxu1 %v2604_v39  ;;  %v3464_v39 = vld [vmem:[%s5580_s1 + $0x84] sm:$0xf]  ;;  %p3777_p11 = scmp.ne.s32.totalorder %s3775_s20, %s3776_s28  ;;  %p3782_p1 = scmp.lt.s32.totalorder %s3780_s16, %s3776_s28 }
  0x5c   : > { %1115 = vmatpush.bf16.msra.mxu2 %v2668_v43  ;;  %1083 = vmatmul.bf16.vlgmr.msrb.gmra.mxu3 %v4199_v13  ;;  %v3520_v13 = vld [vmem:[%s5580_s1 + $0x244] sm:$0xf]  ;;  %v2564_v43 = vor.u32 %v3482_v30, %v2561_v35  ;;  %v2492_v54 = vor.u32 %v3464_v39, %v2489_v40  ;;  %v3546_v39 = vld [vmem:[%s5580_s1 + $0x314] sm:$0xf]  ;;  %v2817_v40 = vld [vmem:[%s5580_s1 + $0x318] sm:$0xf0] }
  0x5d   : > { %1127 = vmatpush.bf16.msra.mxu3 %v2740_v51  ;;  %v2716_v26 = vor.u32 %v3520_v13, %v2713_v17  ;;  %v2865_v51 = vld [vmem:[%s5580_s1 + $0x378] sm:$0xf0]  ;;  %v2684_v13 = vor.u32 %v3512_v3, %v2681_v5  ;;  %v2788_v17 = vor.u32 %v3538_v9, %v2785_v10  ;;  %v3567_v5 = vld [vmem:[%s5582_s3 + $0x34] sm:$0xf0]  ;;  %v2887_v10 = vld [vmem:[%s5582_s3 + $0x20] sm:$0xf]  ;;  %p3778_p12 = pnand %p3777_p11, %p3902_p5  ;;  %p3783_p2 = por %p3782_p1, %p3781_p0 }
  0x5e   : > { %1090 = vmatpush.bf16.msra.mxu0 %v2532_v48  ;;  %v3542_v48 = vld [vmem:[%s5580_s1 + $0x2f4] sm:$0xf] }
  0x5f   : > { %1103 = vmatpush.bf16.msra.mxu1 %v2596_v52  ;;  %v3496_v52 = vld [vmem:[%s5580_s1 + $0x184] sm:$0xf]  ;;  %v2804_v57 = vor.u32 %v3542_v48, %v2801_v49  ;;  %v2929_v48 = vld [vmem:[%s5582_s3 + $0x78] sm:$0xf0]  ;;  %p3779_p13 = pneg %p3778_p12 }
  0x60   : > { %1116 = vmatpush.bf16.msra.mxu2 %v2660_v56  ;;  %v2556_v56 = vor.u32 %v3480_v41, %v2553_v44  ;;  %v2745_v44 = vld [vmem:[%s5580_s1 + $0x288] sm:$0xf0] }
  0x61   : > { %1128 = vmatpush.bf16.msra.mxu3 %v2732_v63  ;;  %v2620_v63 = vor.u32 %v3496_v52, %v2617_v53  ;;  %v2919_v52 = vld [vmem:[%s5582_s3 + $0x60] sm:$0xf]  ;;  %v3573_v53 = vld [vmem:[%s5582_s3 + $0x64] sm:$0xf0]  ;;  %p3784_p3 = pnand %p3783_p2, %p3779_p13 }
  0x62   : > { %1091 = vmatpush.bf16.msra.mxu0 %v2524_v60  ;;  %v2868_v60 = vor.u32 %v3558_v50, %v2865_v51  ;;  %v2812_v50 = vor.u32 %v3544_v45, %v2809_v46  ;;  %v2991_v46 = vld [vmem:[%s5582_s3 + $0xf0] sm:$0xf] }
  0x63   : > { %1104 = vmatpush.bf16.msra.mxu1 %v2588_v0  ;;  %v3556_v0 = vld [vmem:[%s5580_s1 + $0x364] sm:$0xf] }
  0x64   : > { %1117 = vmatpush.bf16.msra.mxu2 %v2652_v4  ;;  %v2796_v4 = vor.u32 %v3540_v61, %v2793_v62  ;;  %v2903_v61 = vld [vmem:[%s5582_s3 + $0x40] sm:$0xf]  ;;  %v3569_v62 = vld [vmem:[%s5582_s3 + $0x44] sm:$0xf0] }
  0x65   : > { %1129 = vmatpush.bf16.msra.mxu3 %v2724_v11  ;;  %v2928_v11 = vor.u32 %v3575_v7, %v2927_v6  ;;  %v3566_v6 = vld [vmem:[%s5582_s3 + $0x34] sm:$0xf] }
  0x66   : > { %1092 = vmatpush.bf16.msra.mxu0 %v2516_v8  ;;  %v2860_v8 = vor.u32 %v3556_v0, %v2857_v1  ;;  %v3568_v0 = vld [vmem:[%s5582_s3 + $0x44] sm:$0xf]  ;;  %v2905_v1 = vld [vmem:[%s5582_s3 + $0x48] sm:$0xf0] }
  0x67   : > { %1105 = vmatpush.bf16.msra.mxu1 %v2580_v14  ;;  %v3554_v14 = vld [vmem:[%s5580_s1 + $0x354] sm:$0xf]  ;;  %v2908_v3 = vor.u32 %v3568_v0, %v2905_v1 }
  0x68   : > { %1118 = vmatpush.bf16.msra.mxu2 %v2644_v18  ;;  %v2852_v18 = vor.u32 %v3554_v14, %v2849_v16  ;;  %v3564_v14 = vld [vmem:[%s5582_s3 + $0x24] sm:$0xf] }
  0x69   : > { %1130 = vmatpush.bf16.msra.mxu3 %v2716_v26  ;;  %v2833_v26 = vld [vmem:[%s5580_s1 + $0x338] sm:$0xf0] }
  0x6a   : > { %1093 = vmatpush.bf16.msra.mxu0 %v2508_v22  ;;  %v3534_v22 = vld [vmem:[%s5580_s1 + $0x2b4] sm:$0xf]  ;;  %v2836_v30 = vor.u32 %v3550_v24, %v2833_v26  ;;  %v2873_v26 = vld [vmem:[%s5582_s3 + $0x8] sm:$0xf0] }
  0x6b   : > { %1106 = vmatpush.bf16.msra.mxu1 %v2572_v28  ;;  %v2772_v28 = vor.u32 %v3534_v22, %v2769_v23  ;;  %v3561_v22 = vld [vmem:[%s5582_s3 + $0x4] sm:$0xf0]  ;;  %v3560_v23 = vld [vmem:[%s5582_s3 + $0x4] sm:$0xf] }
  0x6c   : > { %1119 = vmatpush.bf16.msra.mxu2 %v2636_v34  ;;  %v2825_v34 = vld [vmem:[%s5580_s1 + $0x328] sm:$0xf0] }
  0x6d   : > { %1131 = vmatpush.bf16.msra.mxu3 %v2708_v42  ;;  %v2828_v36 = vor.u32 %v3548_v33, %v2825_v34  ;;  %v2820_v42 = vor.u32 %v3546_v39, %v2817_v40 }
  0x6e   : > { %1094 = vmatpush.bf16.msra.mxu0 %v2500_v38  ;;  %v2753_v38 = vld [vmem:[%s5580_s1 + $0x298] sm:$0xf0] }
  0x6f   : > { %1107 = vmatpush.bf16.msra.mxu1 %v2564_v43  ;;  %v2756_v41 = vor.u32 %v3530_v37, %v2753_v38  ;;  %v3528_v43 = vld [vmem:[%s5580_s1 + $0x284] sm:$0xf] }
  0x70   : > { %1120 = vmatpush.bf16.msra.mxu2 %v2628_v47  ;;  %v3574_v47 = vld [vmem:[%s5582_s3 + $0x74] sm:$0xf]  ;;  %v2748_v49 = vor.u32 %v3528_v43, %v2745_v44 }
  0x71   : > { %1132 = vmatpush.bf16.msra.mxu3 %v2700_v55  ;;  %v2932_v51 = vor.u32 %v3574_v47, %v2929_v48  ;;  %v2920_v55 = vor.u32 %v3573_v53, %v2919_v52  ;;  %v3591_v47 = vld [vmem:[%s5582_s3 + $0xf4] sm:$0xf0]  ;;  %v3590_v48 = vld [vmem:[%s5582_s3 + $0xf4] sm:$0xf]  ;;  %v2983_v52 = vld [vmem:[%s5582_s3 + $0xe0] sm:$0xf] }
  0x72   : > { %1095 = vmatpush.bf16.msra.mxu0 %v2492_v54  ;;  %v3572_v54 = vld [vmem:[%s5582_s3 + $0x64] sm:$0xf]  ;;  %v3589_v53 = vld [vmem:[%s5582_s3 + $0xe4] sm:$0xf0] }
  0x73   : > { %1108 = vmatpush.bf16.msra.mxu1 %v2556_v56  ;;  %v2921_v56 = vld [vmem:[%s5582_s3 + $0x68] sm:$0xf0] }
  0x74   : > { %1121 = vmatpush.bf16.msra.mxu2 %v2620_v63 }
  0x75   : > { %1096 = vmatmul.bf16.vlgmr.msra.gmra.mxu0 %v4201_v15  ;;  %1133 = vmatpush.bf16.msra.mxu3 %v2692_v2  ;;  %v3536_v15 = vld [vmem:[%s5580_s1 + $0x2c4] sm:$0xf]  ;;  %v2904_v2 = vor.u32 %v3569_v62, %v2903_v61 }
  0x76   : > { %1140 = vmatpush.bf16.msrb.mxu0 %v2804_v57  ;;  %1109 = vmatmul.bf16.vlgmr.msra.gmra.mxu1 %v4197_v12  ;;  %v3552_v12 = vld [vmem:[%s5580_s1 + $0x344] sm:$0xf]  ;;  %v3571_v57 = vld [vmem:[%s5582_s3 + $0x54] sm:$0xf0] }
  0x77   : > { %1153 = vmatpush.bf16.msrb.mxu1 %v2868_v60  ;;  %1122 = vmatmul.bf16.vlgmr.msra.gmra.mxu2 %v4222_v25  ;;  %v2780_v25 = vor.u32 %v3536_v15, %v2777_v19  ;;  %v2844_v21 = vor.u32 %v3552_v12, %v2841_v20  ;;  %v2913_v60 = vld [vmem:[%s5582_s3 + $0x58] sm:$0xf0]  ;;  %v3563_v15 = vld [vmem:[%s5582_s3 + $0x14] sm:$0xf0]  ;;  %v3562_v19 = vld [vmem:[%s5582_s3 + $0x14] sm:$0xf] }
  0x78   : > { %1368 = vmatpush.bf16.msrb.mxu2 %v2928_v11  ;;  %v2916_v63 = vor.u32 %v3570_v58, %v2913_v60  ;;  %v3565_v11 = vld [vmem:[%s5582_s3 + $0x24] sm:$0xf0]  ;;  %v2881_v20 = vld [vmem:[%s5582_s3 + $0x18] sm:$0xf0]  ;;  %v2975_v58 = vld [vmem:[%s5582_s3 + $0xd0] sm:$0xf] }
  0x79   : > { %1134 = vmatpush.bf16.msra.mxu3 %v2684_v13  ;;  %v2888_v16 = vor.u32 %v3565_v11, %v2887_v10  ;;  %v2889_v13 = vld [vmem:[%s5582_s3 + $0x28] sm:$0xf0]  ;;  %v3586_v60 = vld [vmem:[%s5582_s3 + $0xd4] sm:$0xf]  ;;  %v2959_v11 = vld [vmem:[%s5582_s3 + $0xb0] sm:$0xf] }
  0x7a   : > { %1141 = vmatpush.bf16.msrb.mxu0 %v2796_v4  ;;  %v2895_v4 = vld [vmem:[%s5582_s3 + $0x30] sm:$0xf]  ;;  %v2969_v10 = vld [vmem:[%s5582_s3 + $0xc8] sm:$0xf0] }
  0x7b   : > { %1154 = vmatpush.bf16.msrb.mxu1 %v2860_v8  ;;  %v2896_v7 = vor.u32 %v3567_v5, %v2895_v4  ;;  %v2897_v8 = vld [vmem:[%s5582_s3 + $0x38] sm:$0xf0] }
  0x7c   : > { %1135 = vmatmul.bf16.vlgmr.msra.gmra.mxu3 %v4340_v27  ;;  %v2761_v27 = vld [vmem:[%s5580_s1 + $0x2a8] sm:$0xf0]  ;;  %1369 = vmatpush.bf16.msrb.mxu2 %v2920_v55  ;;  %v2900_v9 = vor.u32 %v3566_v6, %v2897_v8  ;;  %v3588_v55 = vld [vmem:[%s5582_s3 + $0xe4] sm:$0xf]  ;;  %v2967_v6 = vld [vmem:[%s5582_s3 + $0xc0] sm:$0xf] }
  0x7d   : > { %v2764_v35 = vor.u32 %v3532_v31, %v2761_v27  ;;  %v2876_v31 = vor.u32 %v3560_v23, %v2873_v26  ;;  %v3584_v8 = vld [vmem:[%s5582_s3 + $0xc4] sm:$0xf]  ;;  %v2953_v23 = vld [vmem:[%s5582_s3 + $0xa8] sm:$0xf0] }
  0x7e   : > { %1142 = vmatpush.bf16.msrb.mxu0 %v2788_v17  ;;  %v2892_v17 = vor.u32 %v3564_v14, %v2889_v13  ;;  %v3583_v14 = vld [vmem:[%s5582_s3 + $0xb4] sm:$0xf0]  ;;  %v2972_v13 = vor.u32 %v3584_v8, %v2969_v10  ;;  %v3644_v10 = vld [vmem:[%s5584_s5 + $0x1a0] sm:$0xf0] }
  0x7f   : > { %1155 = vmatpush.bf16.msrb.mxu1 %v2852_v18  ;;  %v2879_v18 = vld [vmem:[%s5582_s3 + $0x10] sm:$0xf] }
  0x80   : > { %v2880_v12 = vor.u32 %v3563_v15, %v2879_v18  ;;  %v2961_v18 = vld [vmem:[%s5582_s3 + $0xb8] sm:$0xf0] }
  0x82   : > { %1143 = vmatpush.bf16.msrb.mxu0 %v2780_v25  ;;  %v2884_v25 = vor.u32 %v3562_v19, %v2881_v20  ;;  %v2960_v19 = vor.u32 %v3583_v14, %v2959_v11  ;;  %v2951_v20 = vld [vmem:[%s5582_s3 + $0xa0] sm:$0xf]  ;;  %v3641_v14 = vld [vmem:[%s5584_s5 + $0x18c] sm:$0xf] }
  0x83   : > { %1156 = vmatpush.bf16.msrb.mxu1 %v2844_v21  ;;  %v2871_v21 = vld [vmem:[%s5582_s3] sm:$0xf] }
  0x84   : > { %v2872_v24 = vor.u32 %v3561_v22, %v2871_v21  ;;  %v3580_v21 = vld [vmem:[%s5582_s3 + $0xa4] sm:$0xf] }
  0x86   : > { %1144 = vmatpush.bf16.msrb.mxu0 %v2772_v28  ;;  %v4722_v28 = vld [vmem:[%s5581_s2] sm:$0x3] }
  0x87   : > { %1157 = vmatpush.bf16.msrb.mxu1 %v2836_v30  ;;  %v395_v33 = vperm.slane %v4722_v28, 0 }
  0x8a   : > { %1145 = vmatpush.bf16.msrb.mxu0 %v2764_v35 }
  0x8b   : > { %1158 = vmatpush.bf16.msrb.mxu1 %v2828_v36 }
  0x8e   : > { %1146 = vmatpush.bf16.msrb.mxu0 %v2756_v41 }
  0x8f   : > { %1159 = vmatpush.bf16.msrb.mxu1 %v2820_v42 }
  0x92   : > { %1147 = vmatpush.bf16.msrb.mxu0 %v2748_v49 }
  0x93   : > { %1160 = vmatpush.bf16.msrb.mxu1 %v2812_v50  ;;  %v2992_v50 = vor.u32 %v3591_v47, %v2991_v46 }
  0x95   : > { %1148 = vmatmul.bf16.vlgmr.msrb.gmra.mxu0 %v4345_v29  ;;  %v2924_v29 = vor.u32 %v3572_v54, %v2921_v56  ;;  %v2985_v56 = vld [vmem:[%s5582_s3 + $0xe8] sm:$0xf0]  ;;  %1381 = vmatpush.bf16.msrb.mxu3 %v2992_v50 }
  0x96   : > { %1394 = vmatpush.bf16.msra.mxu0 %v2932_v51  ;;  %1161 = vmatmul.bf16.vlgmr.msrb.gmra.mxu1 %v4353_v32  ;;  %v2911_v32 = vld [vmem:[%s5582_s3 + $0x50] sm:$0xf]  ;;  %v2993_v51 = vld [vmem:[%s5582_s3 + $0xf8] sm:$0xf0] }
  0x97   : > { %v2912_v59 = vor.u32 %v3571_v57, %v2911_v32  ;;  %v2996_v54 = vor.u32 %v3590_v48, %v2993_v51  ;;  %v2988_v57 = vor.u32 %v3588_v55, %v2985_v56 }
  0x99   : > { %1370 = vmatpush.bf16.msrb.mxu2 %v2912_v59  ;;  %1407 = vmatpush.bf16.msra.mxu1 %v2996_v54  ;;  %v3587_v59 = vld [vmem:[%s5582_s3 + $0xd4] sm:$0xf0] }
  0x9a   : > { %1395 = vmatpush.bf16.msra.mxu0 %v2924_v29  ;;  %v2984_v29 = vor.u32 %v3589_v53, %v2983_v52  ;;  %v2976_v62 = vor.u32 %v3587_v59, %v2975_v58 }
  0x9c   : > { %1382 = vmatpush.bf16.msrb.mxu3 %v2984_v29 }
  0x9d   : > { %1371 = vmatpush.bf16.msrb.mxu2 %v2904_v2  ;;  %1408 = vmatpush.bf16.msra.mxu1 %v2988_v57 }
  0x9e   : > { %1396 = vmatpush.bf16.msra.mxu0 %v2916_v63  ;;  %v2977_v63 = vld [vmem:[%s5582_s3 + $0xd8] sm:$0xf0] }
  0xa0   : > { %1383 = vmatpush.bf16.msrb.mxu3 %v2976_v62  ;;  %v3700_v62 = vld [vmem:[%s5584_s5 + $0x360] sm:$0xf0] }
  0xa1   : > { %1372 = vmatpush.bf16.msrb.mxu2 %v2896_v7  ;;  %v3585_v7 = vld [vmem:[%s5582_s3 + $0xc4] sm:$0xf0] }
  0xa2   : > { %1397 = vmatpush.bf16.msra.mxu0 %v2908_v3  ;;  %v2980_v3 = vor.u32 %v3586_v60, %v2977_v63 }
  0xa4   : > { %1409 = vmatpush.bf16.msra.mxu1 %v2980_v3  ;;  %v3391_v3 = vld [vmem:[%s5584_s5 + $0x310] sm:$0xf] }
  0xa5   : > { %1373 = vmatpush.bf16.msrb.mxu2 %v2888_v16 }
  0xa6   : > { %1398 = vmatpush.bf16.msra.mxu0 %v2900_v9  ;;  %v2968_v9 = vor.u32 %v3585_v7, %v2967_v6  ;;  %v3690_v6 = vld [vmem:[%s5584_s5 + $0x314] sm:$0xf]  ;;  %v3393_v7 = vld [vmem:[%s5584_s5 + $0x32c] sm:$0xf0] }
  0xa7   : > { %v3396_v8 = vor.u32 %v3690_v6, %v3393_v7  ;;  %v3606_v6 = vld [vmem:[%s5584_s5 + $0x74] sm:$0xf]  ;;  %v3057_v7 = vld [vmem:[%s5584_s5 + $0x8c] sm:$0xf0] }
  0xa8   : > { %1384 = vmatpush.bf16.msrb.mxu3 %v2968_v9  ;;  %1410 = vmatpush.bf16.msra.mxu1 %v2972_v13  ;;  %v3195_v9 = vld [vmem:[%s5584_s5 + $0x188] sm:$0xf] }
  0xa9   : > { %1374 = vmatpush.bf16.msrb.mxu2 %v2880_v12  ;;  %v3196_v11 = vor.u32 %v3644_v10, %v3195_v9  ;;  %v3651_v10 = vld [vmem:[%s5584_s5 + $0x1d8] sm:$0xf0] }
  0xaa   : > { %1399 = vmatpush.bf16.msra.mxu0 %v2892_v17  ;;  %v3582_v17 = vld [vmem:[%s5582_s3 + $0xb4] sm:$0xf] }
  0xab   : > { %v2964_v12 = vor.u32 %v3582_v17, %v2961_v18  ;;  %v3363_v17 = vld [vmem:[%s5584_s5 + $0x2d8] sm:$0xf]  ;;  %v3686_v18 = vld [vmem:[%s5584_s5 + $0x2f0] sm:$0xf0] }
  0xac   : > { %1385 = vmatpush.bf16.msrb.mxu3 %v2960_v19  ;;  %v3364_v19 = vor.u32 %v3686_v18, %v3363_v17  ;;  %v3701_v17 = vld [vmem:[%s5584_s5 + $0x368] sm:$0xf0]  ;;  %v3027_v18 = vld [vmem:[%s5584_s5 + $0x38] sm:$0xf] }
  0xad   : > { %1375 = vmatpush.bf16.msrb.mxu2 %v2872_v24  ;;  %1411 = vmatpush.bf16.msra.mxu1 %v2964_v12  ;;  %v2956_v24 = vor.u32 %v3580_v21, %v2953_v23  ;;  %v3365_v12 = vld [vmem:[%s5584_s5 + $0x2f4] sm:$0xf0]  ;;  %v3634_v23 = vld [vmem:[%s5584_s5 + $0x154] sm:$0xf] }
  0xae   : > { %1400 = vmatpush.bf16.msra.mxu0 %v2884_v25  ;;  %v3581_v25 = vld [vmem:[%s5582_s3 + $0xa4] sm:$0xf0] }
  0xaf   : > { %v2952_v22 = vor.u32 %v3581_v25, %v2951_v20  ;;  %v3167_v20 = vld [vmem:[%s5584_s5 + $0x150] sm:$0xf]  ;;  %v3637_v25 = vld [vmem:[%s5584_s5 + $0x168] sm:$0xf0] }
  0xb1   : > { %1386 = vmatpush.bf16.msrb.mxu3 %v2952_v22  ;;  %1412 = vmatpush.bf16.msra.mxu1 %v2956_v24  ;;  %v3168_v22 = vor.u32 %v3637_v25, %v3167_v20  ;;  %v3169_v24 = vld [vmem:[%s5584_s5 + $0x16c] sm:$0xf0] }
  0xb2   : > { %1401 = vmatpush.bf16.msra.mxu0 %v2876_v31  ;;  %v3579_v31 = vld [vmem:[%s5582_s3 + $0x94] sm:$0xf0]  ;;  %2144 = vmatpush.bf16.msra.mxu2 %v3196_v11  ;;  %v3648_v11 = vld [vmem:[%s5584_s5 + $0x1c4] sm:$0xf]  ;;  %v3429_v20 = vld [vmem:[%s5584_s5 + $0x36c] sm:$0xf0] }
  0xb4   : > { %v993_v30 = vpop.f32.mrf.mxu0 }
  0xb5   : > { %v1006_v27 = vpop.f32.mrf.mxu1  ;;  %v994_v34 = vadd.f32 %v993_v30, %v395_v33  ;;  %v2943_v30 = vld [vmem:[%s5582_s3 + $0x90] sm:$0xf] }
  0xb6   : > { %v2944_v33 = vor.u32 %v3579_v31, %v2943_v30  ;;  %v3335_v30 = vld [vmem:[%s5584_s5 + $0x2a0] sm:$0xf]  ;;  %v3679_v31 = vld [vmem:[%s5584_s5 + $0x2b8] sm:$0xf0]  ;;  %2145 = vmatpush.bf16.msra.mxu2 %v3168_v22  ;;  %v3029_v22 = vld [vmem:[%s5584_s5 + $0x54] sm:$0xf0] }
  0xb7   : > { %v1007_v39 = vadd.f32 %v1006_v27, %v994_v34  ;;  %v3578_v27 = vld [vmem:[%s5582_s3 + $0x94] sm:$0xf]  ;;  %v2945_v34 = vld [vmem:[%s5582_s3 + $0x98] sm:$0xf0] }
  0xb8   : > { %1387 = vmatpush.bf16.msrb.mxu3 %v2944_v33  ;;  %v3676_v33 = vld [vmem:[%s5584_s5 + $0x2a4] sm:$0xf] }
  0xbc   : > { %v1019_v35 = vpop.f32.mrf.mxu2  ;;  %v995_v36 = vpop.f32.mrf.mxu0 }
  0xbd   : > { %v1008_v37 = vpop.f32.mrf.mxu1  ;;  %v1020_v40 = vadd.f32 %v1019_v35, %v1007_v39  ;;  %v2948_v35 = vor.u32 %v3578_v27, %v2945_v34  ;;  %v3577_v39 = vld [vmem:[%s5582_s3 + $0x84] sm:$0xf0]  ;;  %v3336_v27 = vor.u32 %v3679_v31, %v3335_v30  ;;  %v3337_v34 = vld [vmem:[%s5584_s5 + $0x2bc] sm:$0xf0] }
  0xbf   : > { %v1032_v38 = vpop.f32.mrf.mxu3  ;;  %1413 = vmatpush.bf16.msra.mxu1 %v2948_v35  ;;  %v3340_v35 = vor.u32 %v3676_v33, %v3337_v34  ;;  %v2999_v33 = vld [vmem:[%s5584_s5] sm:$0xf]  ;;  %v3595_v34 = vld [vmem:[%s5584_s5 + $0x18] sm:$0xf0] }
  0xc0   : > { %v1033_v43 = vadd.f32 %v1032_v38, %v1020_v40  ;;  %v2935_v38 = vld [vmem:[%s5582_s3 + $0x80] sm:$0xf]  ;;  %v3576_v40 = vld [vmem:[%s5582_s3 + $0x84] sm:$0xf] }
  0xc4   : > { %v1021_v41 = vpop.f32.mrf.mxu2 }
  0xc5   : > { %v2936_v41 = vor.u32 %v3577_v39, %v2935_v38  ;;  %v3627_v38 = vld [vmem:[%s5584_s5 + $0x11c] sm:$0xf] }
  0xc7   : > { %v1034_v42 = vpop.f32.mrf.mxu3  ;;  %1388 = vmatpush.bf16.msrb.mxu3 %v2936_v41  ;;  %v3307_v41 = vld [vmem:[%s5584_s5 + $0x268] sm:$0xf] }
  0xc8   : > { %v2937_v42 = vld [vmem:[%s5582_s3 + $0x88] sm:$0xf0] }
  0xd2   : > { %v1045_v44 = vpop.f32.mrf.mxu0 }
  0xd3   : > { %v1058_v45 = vpop.f32.mrf.mxu1  ;;  %v1046_v49 = vadd.f32 %v1045_v44, %v1033_v43  ;;  %v2940_v43 = vor.u32 %v3576_v40, %v2937_v42  ;;  %v396_v44 = vperm.slane %v4722_v28, 1  ;;  %v3419_v28 = vld [vmem:[%s5584_s5 + $0x348] sm:$0xf]  ;;  %v3141_v40 = vld [vmem:[%s5584_s5 + $0x134] sm:$0xf0] }
  0xd4   : > { %v3420_v63 = vor.u32 %v3700_v62, %v3419_v28  ;;  %v3672_v42 = vld [vmem:[%s5584_s5 + $0x280] sm:$0xf0]  ;;  %v3251_v28 = vld [vmem:[%s5584_s5 + $0x1f8] sm:$0xf] }
  0xd5   : > { %v1059_v32 = vadd.f32 %v1058_v45, %v1046_v49  ;;  %1414 = vmatpush.bf16.msra.mxu1 %v2940_v43  ;;  %v3144_v43 = vor.u32 %v3627_v38, %v3141_v40  ;;  %v3592_v38 = vld [vmem:[%s5584_s5 + $0x4] sm:$0xf]  ;;  %v3203_v40 = vld [vmem:[%s5584_s5 + $0x190] sm:$0xf] }
  0xd6   : > { %2157 = vmatpush.bf16.msra.mxu3 %v3420_v63  ;;  %v3658_v63 = vld [vmem:[%s5584_s5 + $0x210] sm:$0xf0] }
  0xda   : > { %v1071_v61 = vpop.f32.mrf.mxu2  ;;  %v1047_v1 = vpop.f32.mrf.mxu0 }
  0xdb   : > { %v1072_v0 = vadd.f32 %v1071_v61, %v1059_v32  ;;  %v1060_v2 = vpop.f32.mrf.mxu1  ;;  %v3421_v1 = vld [vmem:[%s5584_s5 + $0x364] sm:$0xf0] }
  0xdd   : > { %v1166_v4 = vmax.f32 %v1072_v0, 0.0  ;;  %v3697_v0 = vld [vmem:[%s5584_s5 + $0x34c] sm:$0xf] }
  0xde   : > { %v3424_v2 = vor.u32 %v3697_v0, %v3421_v1  ;;  %v3655_v0 = vld [vmem:[%s5584_s5 + $0x1fc] sm:$0xf]  ;;  %v3253_v1 = vld [vmem:[%s5584_s5 + $0x214] sm:$0xf0] }
  0xdf   : > { %v1168_v5 = vpack.c.bf16 %v1166_v4, %v1166_v4  ;;  %v1084_v16 = vpop.f32.mrf.mxu3  ;;  %v3693_v4 = vld [vmem:[%s5584_s5 + $0x328] sm:$0xf0]  ;;  %v3256_v9 = vor.u32 %v3655_v0, %v3253_v1  ;;  %v3147_v1 = vld [vmem:[%s5584_s5 + $0x120] sm:$0xf] }
  0xe0   : > { %v1085_v48 = vadd.f32 %v1084_v16, %v396_v44  ;;  %2183 = vmatpush.bf16.msrb.mxu1 %v3424_v2  ;;  %v3197_v16 = vld [vmem:[%s5584_s5 + $0x1a4] sm:$0xf0]  ;;  %v3308_v44 = vor.u32 %v3672_v42, %v3307_v41  ;;  %v3645_v41 = vld [vmem:[%s5584_s5 + $0x1a8] sm:$0xf0] }
  0xe1   : > { %1376 = vmatmul.bf16.vlgmr.msrb.gmra.mxu2 %v1168_v5  ;;  %1402 = vmatmul.bf16.vlgmr.msra.gmra.mxu0 %v1168_v5  ;;  %v3392_v5 = vor.u32 %v3693_v4, %v3391_v3  ;;  %v3200_v13 = vor.u32 %v3641_v14, %v3197_v16  ;;  %v3055_v3 = vld [vmem:[%s5584_s5 + $0x70] sm:$0xf]  ;;  %v3609_v4 = vld [vmem:[%s5584_s5 + $0x88] sm:$0xf0]  ;;  %v3225_v14 = vld [vmem:[%s5584_s5 + $0x1dc] sm:$0xf0] }
  0xe2   : > { %v1073_v15 = vpop.f32.mrf.mxu2  ;;  %v3056_v16 = vor.u32 %v3609_v4, %v3055_v3 }
  0xe3   : > { %2158 = vmatpush.bf16.msra.mxu3 %v3392_v5  ;;  %v3683_v15 = vld [vmem:[%s5584_s5 + $0x2dc] sm:$0xf]  ;;  %2170 = vmatpush.bf16.msrb.mxu0 %v3200_v13  ;;  %v3252_v5 = vor.u32 %v3658_v63, %v3251_v28  ;;  %v3427_v13 = vld [vmem:[%s5584_s5 + $0x350] sm:$0xf]  ;;  %v3345_v63 = vld [vmem:[%s5584_s5 + $0x2c4] sm:$0xf0] }
  0xe4   : > { %2184 = vmatpush.bf16.msrb.mxu1 %v3396_v8  ;;  %v3368_v21 = vor.u32 %v3683_v15, %v3365_v12  ;;  %v3223_v8 = vld [vmem:[%s5584_s5 + $0x1c0] sm:$0xf]  ;;  %v3060_v15 = vor.u32 %v3606_v6, %v3057_v7  ;;  %v3698_v12 = vld [vmem:[%s5584_s5 + $0x354] sm:$0xf] }
  0xe5   : > { %v3224_v25 = vor.u32 %v3651_v10, %v3223_v8  ;;  %v3432_v31 = vor.u32 %v3698_v12, %v3429_v20  ;;  %v3149_v6 = vld [vmem:[%s5584_s5 + $0x13c] sm:$0xf0]  ;;  %v3315_v8 = vld [vmem:[%s5584_s5 + $0x270] sm:$0xf]  ;;  %v3287_v20 = vld [vmem:[%s5584_s5 + $0x238] sm:$0xf] }
  0xe7   : > { %v1086_v26 = vpop.f32.mrf.mxu3  ;;  %2159 = vmatpush.bf16.msra.mxu3 %v3364_v19  ;;  %v3602_v19 = vld [vmem:[%s5584_s5 + $0x50] sm:$0xf0] }
  0xe8   : > { %2185 = vmatpush.bf16.msrb.mxu1 %v3368_v21  ;;  %v3172_v26 = vor.u32 %v3634_v23, %v3169_v24  ;;  %v3599_v21 = vld [vmem:[%s5584_s5 + $0x3c] sm:$0xf]  ;;  %v3228_v23 = vor.u32 %v3648_v11, %v3225_v14  ;;  %v3428_v24 = vor.u32 %v3701_v17, %v3427_v13  ;;  %v3028_v30 = vor.u32 %v3602_v19, %v3027_v18  ;;  %v3670_v11 = vld [vmem:[%s5584_s5 + $0x274] sm:$0xf]  ;;  %v3317_v14 = vld [vmem:[%s5584_s5 + $0x28c] sm:$0xf0] }
  0xe9   : > { %v3119_v13 = vld [vmem:[%s5584_s5 + $0xe8] sm:$0xf]  ;;  %v3624_v17 = vld [vmem:[%s5584_s5 + $0x100] sm:$0xf0]  ;;  %v3320_v12 = vor.u32 %v3670_v11, %v3317_v14  ;;  %v3699_v11 = vld [vmem:[%s5584_s5 + $0x35c] sm:$0xf] }
  0xea   : > { %2171 = vmatpush.bf16.msrb.mxu0 %v3172_v26  ;;  %v3399_v26 = vld [vmem:[%s5584_s5 + $0x318] sm:$0xf]  ;;  %v3121_v19 = vld [vmem:[%s5584_s5 + $0x104] sm:$0xf0] }
  0xeb   : > { %2160 = vmatpush.bf16.msra.mxu3 %v3336_v27  ;;  %v3694_v27 = vld [vmem:[%s5584_s5 + $0x330] sm:$0xf0]  ;;  %v3437_v14 = vld [vmem:[%s5584_s5 + $0x374] sm:$0xf0] }
  0xec   : > { %2186 = vmatpush.bf16.msrb.mxu1 %v3340_v35  ;;  %v3032_v35 = vor.u32 %v3599_v21, %v3029_v22  ;;  %v3120_v22 = vor.u32 %v3624_v17, %v3119_v13  ;;  %v3440_v13 = vor.u32 %v3699_v11, %v3437_v14  ;;  %v3407_v17 = vld [vmem:[%s5584_s5 + $0x320] sm:$0xf]  ;;  %v3099_v14 = vld [vmem:[%s5584_s5 + $0xb8] sm:$0xf] }
  0xee   : > { %2172 = vmatpush.bf16.msrb.mxu0 %v3144_v43  ;;  %v3400_v43 = vor.u32 %v3694_v27, %v3399_v26  ;;  %v3091_v27 = vld [vmem:[%s5584_s5 + $0xb0] sm:$0xf] }
  0xef   : > { %2161 = vmatpush.bf16.msra.mxu3 %v3308_v44  ;;  %v3642_v44 = vld [vmem:[%s5584_s5 + $0x194] sm:$0xf] }
  0xf2   : > { %v1097_v36 = vpop.f32.mrf.mxu0 }
  0xf3   : > { %v1110_v37 = vpop.f32.mrf.mxu1  ;;  %v1098_v50 = vadd.f32 %v1097_v36, %v1085_v48  ;;  %v3139_v36 = vld [vmem:[%s5584_s5 + $0x118] sm:$0xf] }
  0xf5   : > { %v1111_v52 = vadd.f32 %v1110_v37, %v1098_v50  ;;  %v3630_v37 = vld [vmem:[%s5584_s5 + $0x130] sm:$0xf0]  ;;  %v3620_v50 = vld [vmem:[%s5584_s5 + $0xe4] sm:$0xf] }
  0xf6   : > { %v3140_v39 = vor.u32 %v3630_v37, %v3139_v36  ;;  %v3691_v36 = vld [vmem:[%s5584_s5 + $0x31c] sm:$0xf]  ;;  %v3401_v37 = vld [vmem:[%s5584_s5 + $0x334] sm:$0xf0] }
  0xf8   : > { %2146 = vmatpush.bf16.msra.mxu2 %v3140_v39  ;;  %v3001_v39 = vld [vmem:[%s5584_s5 + $0x1c] sm:$0xf0] }
  0xfa   : > { %v1099_v45 = vpop.f32.mrf.mxu0  ;;  %v1123_v46 = vpop.f32.mrf.mxu2 }
  0xfb   : > { %v1112_v47 = vpop.f32.mrf.mxu1  ;;  %v1124_v54 = vadd.f32 %v1123_v46, %v1111_v52  ;;  %v3669_v45 = vld [vmem:[%s5584_s5 + $0x26c] sm:$0xf]  ;;  %v3309_v46 = vld [vmem:[%s5584_s5 + $0x284] sm:$0xf0] }
  0xfc   : > { %v3111_v47 = vld [vmem:[%s5584_s5 + $0xe0] sm:$0xf]  ;;  %v3312_v48 = vor.u32 %v3669_v45, %v3309_v46  ;;  %v3205_v45 = vld [vmem:[%s5584_s5 + $0x1ac] sm:$0xf0]  ;;  %v3000_v46 = vor.u32 %v3595_v34, %v2999_v33  ;;  %v3617_v33 = vld [vmem:[%s5584_s5 + $0xc8] sm:$0xf0] }
  0xfd   : > { %v3092_v34 = vor.u32 %v3617_v33, %v3091_v27  ;;  %v3379_v27 = vld [vmem:[%s5584_s5 + $0x2e8] sm:$0xf]  ;;  %v3688_v33 = vld [vmem:[%s5584_s5 + $0x300] sm:$0xf0] }
  0xfe   : > { %2187 = vmatpush.bf16.msrb.mxu1 %v3312_v48  ;;  %v3371_v48 = vld [vmem:[%s5584_s5 + $0x2e0] sm:$0xf] }
  0xff   : > { %v1136_v49 = vpop.f32.mrf.mxu3 }
 0x100   : > { %v1137_v55 = vadd.f32 %v1136_v49, %v1124_v54  ;;  %v3623_v49 = vld [vmem:[%s5584_s5 + $0xf8] sm:$0xf0]  ;;  %v3279_v54 = vld [vmem:[%s5584_s5 + $0x230] sm:$0xf] }
 0x101   : > { %v3112_v52 = vor.u32 %v3623_v49, %v3111_v47  ;;  %v3404_v47 = vor.u32 %v3691_v36, %v3401_v37  ;;  %v3687_v49 = vld [vmem:[%s5584_s5 + $0x2f8] sm:$0xf0]  ;;  %v3093_v36 = vld [vmem:[%s5584_s5 + $0xcc] sm:$0xf0] }
 0x102   : > { %v1125_v51 = vpop.f32.mrf.mxu2 }
 0x103   : > { %v3113_v51 = vld [vmem:[%s5584_s5 + $0xfc] sm:$0xf0]  ;;  %2147 = vmatpush.bf16.msra.mxu2 %v3112_v52  ;;  %v3684_v52 = vld [vmem:[%s5584_s5 + $0x2e4] sm:$0xf] }
 0x107   : > { %v1138_v53 = vpop.f32.mrf.mxu3 }
 0x108   : > { %v3116_v53 = vor.u32 %v3620_v50, %v3113_v51  ;;  %v3004_v50 = vor.u32 %v3592_v38, %v3001_v39  ;;  %v3204_v51 = vor.u32 %v3645_v41, %v3203_v40  ;;  %v3259_v38 = vld [vmem:[%s5584_s5 + $0x200] sm:$0xf]  ;;  %v3659_v39 = vld [vmem:[%s5584_s5 + $0x218] sm:$0xf0]  ;;  %v3656_v41 = vld [vmem:[%s5584_s5 + $0x204] sm:$0xf] }
 0x109   : > { %v3260_v40 = vor.u32 %v3659_v39, %v3259_v38  ;;  %v3183_v39 = vld [vmem:[%s5584_s5 + $0x160] sm:$0xf] }
 0x10a   : > { %2173 = vmatpush.bf16.msrb.mxu0 %v3116_v53  ;;  %v3373_v53 = vld [vmem:[%s5584_s5 + $0x2fc] sm:$0xf0] }
 0x112   : > { %v1149_v56 = vpop.f32.mrf.mxu0 }
 0x113   : > { %v1150_v29 = vadd.f32 %v1149_v56, %v1137_v55  ;;  %v1162_v32 = vpop.f32.mrf.mxu1  ;;  %v3665_v55 = vld [vmem:[%s5584_s5 + $0x248] sm:$0xf0]  ;;  %v3662_v56 = vld [vmem:[%s5584_s5 + $0x234] sm:$0xf] }
 0x115   : > { %v1163_v57 = vadd.f32 %v1162_v32, %v1150_v29  ;;  %v3280_v29 = vor.u32 %v3665_v55, %v3279_v54  ;;  %v3281_v32 = vld [vmem:[%s5584_s5 + $0x24c] sm:$0xf0]  ;;  %v3208_v54 = vor.u32 %v3642_v44, %v3205_v45  ;;  %v3175_v55 = vld [vmem:[%s5584_s5 + $0x158] sm:$0xf] }
 0x116   : > { %v3063_v45 = vld [vmem:[%s5584_s5 + $0x78] sm:$0xf] }
 0x117   : > { %v1167_v58 = vmax.f32 %v1163_v57, 0.0  ;;  %v3083_v57 = vld [vmem:[%s5584_s5 + $0xa8] sm:$0xf]  ;;  %2162 = vmatpush.bf16.msra.mxu3 %v3280_v29  ;;  %v3372_v29 = vor.u32 %v3687_v49, %v3371_v48  ;;  %v3607_v48 = vld [vmem:[%s5584_s5 + $0x7c] sm:$0xf] }
 0x118   : > { %v3065_v49 = vld [vmem:[%s5584_s5 + $0x94] sm:$0xf0] }
 0x119   : > { %v1169_v59 = vpack.c.bf16 %v1167_v58, %v1167_v58  ;;  %v3616_v58 = vld [vmem:[%s5584_s5 + $0xc0] sm:$0xf0] }
 0x11a   : > { %v1151_v60 = vpop.f32.mrf.mxu0  ;;  %v3084_v62 = vor.u32 %v3616_v58, %v3083_v57  ;;  %v3177_v57 = vld [vmem:[%s5584_s5 + $0x174] sm:$0xf0]  ;;  %v3376_v58 = vor.u32 %v3684_v52, %v3373_v53  ;;  %v3652_v52 = vld [vmem:[%s5584_s5 + $0x1e0] sm:$0xf0] }
 0x11b   : > { %v1164_v61 = vpop.f32.mrf.mxu1  ;;  %1389 = vmatmul.bf16.vlgmr.msrb.gmra.mxu3 %v1169_v59  ;;  %1415 = vmatmul.bf16.vlgmr.msra.gmra.mxu1 %v1169_v59  ;;  %v3284_v59 = vor.u32 %v3662_v56, %v3281_v32  ;;  %v3613_v60 = vld [vmem:[%s5584_s5 + $0xac] sm:$0xf]  ;;  %v3638_v56 = vld [vmem:[%s5584_s5 + $0x170] sm:$0xf0]  ;;  %v3635_v32 = vld [vmem:[%s5584_s5 + $0x15c] sm:$0xf] }
 0x11c   : > { %v3085_v61 = vld [vmem:[%s5584_s5 + $0xc4] sm:$0xf0]  ;;  %2148 = vmatpush.bf16.msra.mxu2 %v3084_v62  ;;  %2163 = vmatpush.bf16.msra.mxu3 %v3252_v5  ;;  %v3176_v28 = vor.u32 %v3638_v56, %v3175_v55  ;;  %v3677_v62 = vld [vmem:[%s5584_s5 + $0x2ac] sm:$0xf]  ;;  %v3180_v0 = vor.u32 %v3635_v32, %v3177_v57  ;;  %v3628_v5 = vld [vmem:[%s5584_s5 + $0x124] sm:$0xf] }
 0x11d   : > { %v3088_v2 = vor.u32 %v3613_v60, %v3085_v61  ;;  %2188 = vmatpush.bf16.msrb.mxu1 %v3284_v59  ;;  %v3343_v59 = vld [vmem:[%s5584_s5 + $0x2a8] sm:$0xf]  ;;  %v3680_v60 = vld [vmem:[%s5584_s5 + $0x2c0] sm:$0xf0]  ;;  %v3348_v7 = vor.u32 %v3677_v62, %v3345_v63  ;;  %v3603_v32 = vld [vmem:[%s5584_s5 + $0x58] sm:$0xf0] }
 0x11e   : > { %v3344_v4 = vor.u32 %v3680_v60, %v3343_v59  ;;  %v3233_v55 = vld [vmem:[%s5584_s5 + $0x1e4] sm:$0xf0]  ;;  %v3037_v59 = vld [vmem:[%s5584_s5 + $0x5c] sm:$0xf0]  ;;  %v3596_v62 = vld [vmem:[%s5584_s5 + $0x20] sm:$0xf0] }
 0x11f   : > { %2174 = vmatpush.bf16.msrb.mxu0 %v3088_v2  ;;  %v3631_v2 = vld [vmem:[%s5584_s5 + $0x138] sm:$0xf0] }
 0x120   : > { %2149 = vmatpush.bf16.msra.mxu2 %v3056_v16  ;;  %2164 = vmatpush.bf16.msra.mxu3 %v3224_v25  ;;  %v3148_v10 = vor.u32 %v3631_v2, %v3147_v1  ;;  %v3152_v16 = vor.u32 %v3628_v5, %v3149_v6  ;;  %v3666_v25 = vld [vmem:[%s5584_s5 + $0x250] sm:$0xf0]  ;;  %v3009_v1 = vld [vmem:[%s5584_s5 + $0x24] sm:$0xf0] }
 0x121   : > { %2189 = vmatpush.bf16.msrb.mxu1 %v3256_v9  ;;  %v3673_v9 = vld [vmem:[%s5584_s5 + $0x288] sm:$0xf0] }
 0x122   : > { %v3316_v18 = vor.u32 %v3673_v9, %v3315_v8  ;;  %v3435_v8 = vld [vmem:[%s5584_s5 + $0x358] sm:$0xf] }
 0x123   : > { %2175 = vmatpush.bf16.msrb.mxu0 %v3060_v15  ;;  %v3621_v15 = vld [vmem:[%s5584_s5 + $0xec] sm:$0xf] }
 0x124   : > { %2209 = vmatpush.bf16.msrb.mxu3 %v3428_v24  ;;  %2150 = vmatpush.bf16.msra.mxu2 %v3028_v30  ;;  %v3289_v24 = vld [vmem:[%s5584_s5 + $0x254] sm:$0xf0]  ;;  %v3124_v26 = vor.u32 %v3621_v15, %v3121_v19  ;;  %v3288_v30 = vor.u32 %v3666_v25, %v3287_v20  ;;  %v3695_v19 = vld [vmem:[%s5584_s5 + $0x338] sm:$0xf0]  ;;  %v3409_v20 = vld [vmem:[%s5584_s5 + $0x33c] sm:$0xf0] }
 0x125   : > { %2190 = vmatpush.bf16.msrb.mxu1 %v3228_v23  ;;  %v3663_v23 = vld [vmem:[%s5584_s5 + $0x23c] sm:$0xf] }
 0x127   : > { %2176 = vmatpush.bf16.msrb.mxu0 %v3032_v35  ;;  %v3614_v35 = vld [vmem:[%s5584_s5 + $0xb4] sm:$0xf] }
 0x128   : > { %2210 = vmatpush.bf16.msrb.mxu3 %v3400_v43  ;;  %2151 = vmatpush.bf16.msra.mxu2 %v3000_v46  ;;  %v3096_v37 = vor.u32 %v3614_v35, %v3093_v36  ;;  %v3261_v43 = vld [vmem:[%s5584_s5 + $0x21c] sm:$0xf0]  ;;  %v3610_v46 = vld [vmem:[%s5584_s5 + $0x90] sm:$0xf0]  ;;  %v3685_v35 = vld [vmem:[%s5584_s5 + $0x2ec] sm:$0xf] }
 0x129   : > { %2235 = vmatpush.bf16.msra.mxu1 %v3432_v31  ;;  %v3292_v31 = vor.u32 %v3663_v23, %v3289_v24  ;;  %v3264_v44 = vor.u32 %v3656_v41, %v3261_v43  ;;  %v3643_v23 = vld [vmem:[%s5584_s5 + $0x19c] sm:$0xf]  ;;  %v3213_v24 = vld [vmem:[%s5584_s5 + $0x1b4] sm:$0xf0]  ;;  %v3381_v36 = vld [vmem:[%s5584_s5 + $0x304] sm:$0xf0] }
 0x12a   : > { %v3216_v38 = vor.u32 %v3643_v23, %v3213_v24  ;;  %v3639_v41 = vld [vmem:[%s5584_s5 + $0x178] sm:$0xf0]  ;;  %v3636_v43 = vld [vmem:[%s5584_s5 + $0x164] sm:$0xf] }
 0x12b   : > { %2177 = vmatpush.bf16.msrb.mxu0 %v3004_v50  ;;  %v3068_v50 = vor.u32 %v3607_v48, %v3065_v49  ;;  %v3681_v48 = vld [vmem:[%s5584_s5 + $0x2c8] sm:$0xf0]  ;;  %v3678_v49 = vld [vmem:[%s5584_s5 + $0x2b4] sm:$0xf]  ;;  %v3611_v23 = vld [vmem:[%s5584_s5 + $0x98] sm:$0xf0] }
 0x12c   : > { %2196 = vmatpush.bf16.msrb.mxu2 %v3204_v51  ;;  %2211 = vmatpush.bf16.msrb.mxu3 %v3372_v29  ;;  %v3231_v51 = vld [vmem:[%s5584_s5 + $0x1c8] sm:$0xf]  ;;  %v3035_v29 = vld [vmem:[%s5584_s5 + $0x40] sm:$0xf]  ;;  %v3608_v24 = vld [vmem:[%s5584_s5 + $0x84] sm:$0xf] }
 0x12d   : > { %2236 = vmatpush.bf16.msra.mxu1 %v3404_v47  ;;  %v3064_v47 = vor.u32 %v3610_v46, %v3063_v45  ;;  %v3232_v53 = vor.u32 %v3652_v52, %v3231_v51  ;;  %v3036_v57 = vor.u32 %v3603_v32, %v3035_v29  ;;  %v3380_v45 = vor.u32 %v3688_v33, %v3379_v27  ;;  %v3157_v29 = vld [vmem:[%s5584_s5 + $0x144] sm:$0xf0]  ;;  %v3239_v27 = vld [vmem:[%s5584_s5 + $0x1d0] sm:$0xf]  ;;  %v3653_v33 = vld [vmem:[%s5584_s5 + $0x1e8] sm:$0xf0] }
 0x12e   : > { %v3384_v46 = vor.u32 %v3685_v35, %v3381_v36  ;;  %v3184_v52 = vor.u32 %v3639_v41, %v3183_v39  ;;  %v3241_v35 = vld [vmem:[%s5584_s5 + $0x1ec] sm:$0xf0]  ;;  %v3703_v39 = vld [vmem:[%s5584_s5 + $0x378] sm:$0xf0]  ;;  %v3043_v41 = vld [vmem:[%s5584_s5 + $0x48] sm:$0xf] }
 0x12f   : > { %2222 = vmatpush.bf16.msra.mxu0 %v3208_v54  ;;  %v3649_v54 = vld [vmem:[%s5584_s5 + $0x1cc] sm:$0xf] }
 0x130   : > { %2197 = vmatpush.bf16.msrb.mxu2 %v3176_v28  ;;  %2212 = vmatpush.bf16.msrb.mxu3 %v3344_v4  ;;  %v3236_v56 = vor.u32 %v3649_v54, %v3233_v55  ;;  %v3007_v28 = vld [vmem:[%s5584_s5 + $0x8] sm:$0xf]  ;;  %v3632_v55 = vld [vmem:[%s5584_s5 + $0x140] sm:$0xf0] }
 0x131   : > { %2237 = vmatpush.bf16.msra.mxu1 %v3376_v58  ;;  %v3600_v58 = vld [vmem:[%s5584_s5 + $0x44] sm:$0xf]  ;;  %v3008_v63 = vor.u32 %v3596_v62, %v3007_v28  ;;  %v3155_v54 = vld [vmem:[%s5584_s5 + $0x128] sm:$0xf]  ;;  %v3325_v28 = vld [vmem:[%s5584_s5 + $0x294] sm:$0xf0] }
 0x132   : > { %v3040_v60 = vor.u32 %v3600_v58, %v3037_v59  ;;  %v3323_v58 = vld [vmem:[%s5584_s5 + $0x278] sm:$0xf]  ;;  %v3674_v59 = vld [vmem:[%s5584_s5 + $0x290] sm:$0xf0]  ;;  %v3156_v62 = vor.u32 %v3632_v55, %v3155_v54  ;;  %v3597_v54 = vld [vmem:[%s5584_s5 + $0x28] sm:$0xf0] }
 0x133   : > { %2223 = vmatpush.bf16.msra.mxu0 %v3180_v0  ;;  %v3593_v0 = vld [vmem:[%s5584_s5 + $0xc] sm:$0xf]  ;;  %v3594_v55 = vld [vmem:[%s5584_s5 + $0x14] sm:$0xf] }
 0x134   : > { %2198 = vmatpush.bf16.msrb.mxu2 %v3148_v10  ;;  %2213 = vmatpush.bf16.msrb.mxu3 %v3316_v18  ;;  %v3012_v2 = vor.u32 %v3593_v0, %v3009_v1  ;;  %v3702_v10 = vld [vmem:[%s5584_s5 + $0x370] sm:$0xf0]  ;;  %v3127_v0 = vld [vmem:[%s5584_s5 + $0xf0] sm:$0xf]  ;;  %v3625_v1 = vld [vmem:[%s5584_s5 + $0x108] sm:$0xf0] }
 0x135   : > { %2238 = vmatpush.bf16.msra.mxu1 %v3348_v7 }
 0x137   : > { %2224 = vmatpush.bf16.msra.mxu0 %v3152_v16  ;;  %v3436_v16 = vor.u32 %v3702_v10, %v3435_v8  ;;  %v3664_v8 = vld [vmem:[%s5584_s5 + $0x244] sm:$0xf]  ;;  %v3128_v10 = vor.u32 %v3625_v1, %v3127_v0 }
 0x138   : > { %2199 = vmatpush.bf16.msrb.mxu2 %v3120_v22  ;;  %2214 = vmatpush.bf16.msrb.mxu3 %v3288_v30  ;;  %v3646_v22 = vld [vmem:[%s5584_s5 + $0x1b0] sm:$0xf0]  ;;  %v3408_v30 = vor.u32 %v3695_v19, %v3407_v17  ;;  %v3267_v19 = vld [vmem:[%s5584_s5 + $0x208] sm:$0xf]  ;;  %v3640_v0 = vld [vmem:[%s5584_s5 + $0x180] sm:$0xf0] }
 0x139   : > { %2239 = vmatpush.bf16.msra.mxu1 %v3320_v12  ;;  %v3692_v12 = vld [vmem:[%s5584_s5 + $0x324] sm:$0xf] }
 0x13b   : > { %2225 = vmatpush.bf16.msra.mxu0 %v3124_v26 }
 0x13c   : > { %2200 = vmatpush.bf16.msrb.mxu2 %v3092_v34  ;;  %2215 = vmatpush.bf16.msrb.mxu3 %v3260_v40 }
 0x13d   : > { %2240 = vmatpush.bf16.msra.mxu1 %v3292_v31  ;;  %v3412_v31 = vor.u32 %v3692_v12, %v3409_v20  ;;  %v3660_v12 = vld [vmem:[%s5584_s5 + $0x220] sm:$0xf0]  ;;  %v3657_v20 = vld [vmem:[%s5584_s5 + $0x20c] sm:$0xf] }
 0x13f   : > { %2226 = vmatpush.bf16.msra.mxu0 %v3096_v37 }
 0x140   : > { %2201 = vmatpush.bf16.msrb.mxu2 %v3064_v47  ;;  %2216 = vmatpush.bf16.msrb.mxu3 %v3232_v53  ;;  %v3351_v47 = vld [vmem:[%s5584_s5 + $0x2b0] sm:$0xf] }
 0x141   : > { %2241 = vmatpush.bf16.msra.mxu1 %v3264_v44  ;;  %v3185_v44 = vld [vmem:[%s5584_s5 + $0x17c] sm:$0xf0]  ;;  %v3352_v32 = vor.u32 %v3681_v48, %v3351_v47 }
 0x142   : > { %v3188_v53 = vor.u32 %v3636_v43, %v3185_v44  ;;  %v3604_v43 = vld [vmem:[%s5584_s5 + $0x60] sm:$0xf0]  ;;  %v3601_v44 = vld [vmem:[%s5584_s5 + $0x4c] sm:$0xf] }
 0x143   : > { %2227 = vmatpush.bf16.msra.mxu0 %v3068_v50  ;;  %v3353_v50 = vld [vmem:[%s5584_s5 + $0x2cc] sm:$0xf0] }
 0x144   : > { %2202 = vmatpush.bf16.msrb.mxu2 %v3036_v57  ;;  %v3356_v57 = vor.u32 %v3678_v49, %v3353_v50  ;;  %v3044_v49 = vor.u32 %v3604_v43, %v3043_v41 }
 0x145   : > { %2242 = vmatpush.bf16.msra.mxu1 %v3236_v56  ;;  %v3629_v56 = vld [vmem:[%s5584_s5 + $0x12c] sm:$0xf] }
 0x147   : > { %2228 = vmatpush.bf16.msra.mxu0 %v3040_v60  ;;  %v3671_v60 = vld [vmem:[%s5584_s5 + $0x27c] sm:$0xf] }
 0x148   : > { %2203 = vmatpush.bf16.msrb.mxu2 %v3008_v63  ;;  %v3160_v63 = vor.u32 %v3629_v56, %v3157_v29  ;;  %v3017_v56 = vld [vmem:[%s5584_s5 + $0x2c] sm:$0xf0]  ;;  %v3219_v29 = vld [vmem:[%s5584_s5 + $0x1a0] sm:$0xf] }
 0x14b   : > { %2229 = vmatpush.bf16.msra.mxu0 %v3012_v2  ;;  %v3622_v2 = vld [vmem:[%s5584_s5 + $0xf4] sm:$0xf] }
 0x15e   : > { %v5044_v42 = vpop.f32.mrf.mxu0 }
 0x164   : > { %v5082_v61 = vpop.f32.mrf.mxu2 }
 0x166   : > { %v1405_v3 = vpop.f32.mrf.mxu0 }
 0x167   : > { %v1202_v3 = vld [vmem:[%s5583_s4] sm:$0x3] }
 0x168   : > { %v1205_v4 = vperm.slane %v1202_v3, 1  ;;  %v1204_v6 = vperm.slane %v1202_v3, 0  ;;  %v3129_v3 = vld [vmem:[%s5584_s5 + $0x10c] sm:$0xf0] }
 0x169   : > { %v3132_v11 = vor.u32 %v3622_v2, %v3129_v3  ;;  %v3359_v2 = vld [vmem:[%s5584_s5 + $0x2b8] sm:$0xf]  ;;  %v3682_v3 = vld [vmem:[%s5584_s5 + $0x2d0] sm:$0xf0] }
 0x16a   : > { %v1404_v5 = vadd.f32 %v5044_v42, %v1205_v4  ;;  %v1378_v18 = vadd.f32 %v5082_v61, %v1204_v6  ;;  %v3324_v4 = vor.u32 %v3674_v59, %v3323_v58  ;;  %v3295_v6 = vld [vmem:[%s5584_s5 + $0x240] sm:$0xf]  ;;  %v3020_v59 = vor.u32 %v3594_v55, %v3017_v56 }
 0x16c   : > { %v1379_v21 = vpop.f32.mrf.mxu2 }
 0x16d   : > { %v3211_v21 = vld [vmem:[%s5584_s5 + $0x198] sm:$0xf] }
 0x16e   : > { %v3212_v37 = vor.u32 %v3646_v22, %v3211_v21  ;;  %v3071_v22 = vld [vmem:[%s5584_s5 + $0x80] sm:$0xf] }
 0x16f   : > { %v3072_v36 = vor.u32 %v3611_v23, %v3071_v22  ;;  %v3612_v22 = vld [vmem:[%s5584_s5 + $0xa0] sm:$0xf0] }
 0x198   : > { %v1416_v7 = vpop.f32.mrf.mxu1 }
 0x199   : > { %v1417_v9 = vadd.f32 %v1416_v7, %v1404_v5  ;;  %v3328_v5 = vor.u32 %v3671_v60, %v3325_v28  ;;  %v3667_v7 = vld [vmem:[%s5584_s5 + $0x258] sm:$0xf0]  ;;  %v3387_v60 = vld [vmem:[%s5584_s5 + $0x2f0] sm:$0xf]  ;;  %v3689_v28 = vld [vmem:[%s5584_s5 + $0x308] sm:$0xf0] }
 0x19a   : > { %v3296_v17 = vor.u32 %v3667_v7, %v3295_v6  ;;  %v3388_v1 = vor.u32 %v3689_v28, %v3387_v60  ;;  %v3633_v6 = vld [vmem:[%s5584_s5 + $0x148] sm:$0xf0]  ;;  %v3360_v7 = vor.u32 %v3682_v3, %v3359_v2 }
 0x19b   : > { %v1421_v42 = vmax.f32 %v1417_v9, 0.0  ;;  %v3297_v9 = vld [vmem:[%s5584_s5 + $0x25c] sm:$0xf0] }
 0x19d   : > { %v5230_v15 = vpack.c.bf16 %v1421_v42, %v1421_v42  ;;  %v3618_v42 = vld [vmem:[%s5584_s5 + $0xd0] sm:$0xf0] }
 0x19e   : > { %v1390_v25 = vpop.f32.mrf.mxu3  ;;  %v3100_v21 = vor.u32 %v3618_v42, %v3099_v14  ;;  %v3626_v14 = vld [vmem:[%s5584_s5 + $0x110] sm:$0xf0] }
 0x19f   : > { %v1391_v61 = vadd.f32 %v1390_v25, %v1378_v18  ;;  %2165 = vmatmul.bf16.vlgmr.msra.gmra.mxu3 %v5230_v15  ;;  %2191 = vmatmul.bf16.vlgmr.msrb.gmra.mxu1 %v5230_v15  ;;  %v3300_v18 = vor.u32 %v3664_v8, %v3297_v9  ;;  %v3269_v25 = vld [vmem:[%s5584_s5 + $0x224] sm:$0xf0]  ;;  %v3331_v8 = vld [vmem:[%s5584_s5 + $0x280] sm:$0xf]  ;;  %v3675_v9 = vld [vmem:[%s5584_s5 + $0x298] sm:$0xf0] }
 0x1a0   : > { %2261 = vmatpush.bf16.msra.mxu3 %v3436_v16  ;;  %v1418_v26 = vpop.f32.mrf.mxu1  ;;  %2287 = vmatpush.bf16.msrb.mxu1 %v3440_v13  ;;  %v3615_v16 = vld [vmem:[%s5584_s5 + $0xbc] sm:$0xf]  ;;  %v3101_v13 = vld [vmem:[%s5584_s5 + $0xd4] sm:$0xf0]  ;;  %v3332_v42 = vor.u32 %v3675_v9, %v3331_v8 }
 0x1a1   : > { %v1420_v34 = vmax.f32 %v1391_v61, 0.0  ;;  %v3104_v61 = vor.u32 %v3615_v16, %v3101_v13  ;;  %v3073_v26 = vld [vmem:[%s5584_s5 + $0x9c] sm:$0xf0]  ;;  %v3303_v16 = vld [vmem:[%s5584_s5 + $0x248] sm:$0xf] }
 0x1a2   : > { %v3668_v13 = vld [vmem:[%s5584_s5 + $0x260] sm:$0xf0] }
 0x1a3   : > { %v5270_v40 = vpack.c.bf16 %v1420_v34, %v1420_v34  ;;  %v3650_v34 = vld [vmem:[%s5584_s5 + $0x1d4] sm:$0xf] }
 0x1a4   : > { %2262 = vmatpush.bf16.msra.mxu3 %v3408_v30  ;;  %2288 = vmatpush.bf16.msrb.mxu1 %v3412_v31  ;;  %v3268_v30 = vor.u32 %v3660_v12, %v3267_v19  ;;  %v3272_v31 = vor.u32 %v3657_v20, %v3269_v25  ;;  %v3244_v47 = vor.u32 %v3650_v34, %v3241_v35  ;;  %v3619_v19 = vld [vmem:[%s5584_s5 + $0xd8] sm:$0xf0]  ;;  %v3275_v20 = vld [vmem:[%s5584_s5 + $0x210] sm:$0xf]  ;;  %v3661_v25 = vld [vmem:[%s5584_s5 + $0x228] sm:$0xf0] }
 0x1a5   : > { %2152 = vmatmul.bf16.vlgmr.msra.gmra.mxu2 %v5270_v40  ;;  %2178 = vmatmul.bf16.vlgmr.msrb.gmra.mxu0 %v5270_v40  ;;  %v3304_v12 = vor.u32 %v3668_v13, %v3303_v16  ;;  %v3276_v23 = vor.u32 %v3661_v25, %v3275_v20  ;;  %v3023_v35 = vld [vmem:[%s5584_s5 + $0x18] sm:$0xf] }
 0x1a6   : > { %2248 = vmatpush.bf16.msra.mxu2 %v3212_v37  ;;  %v1392_v51 = vpop.f32.mrf.mxu3  ;;  %2274 = vmatpush.bf16.msrb.mxu0 %v3216_v38  ;;  %v3076_v37 = vor.u32 %v3608_v24, %v3073_v26  ;;  %v3443_v38 = vld [vmem:[%s5584_s5 + $0x360] sm:$0xf]  ;;  %v3247_v24 = vld [vmem:[%s5584_s5 + $0x1d8] sm:$0xf]  ;;  %v3654_v26 = vld [vmem:[%s5584_s5 + $0x1f0] sm:$0xf0] }
 0x1a7   : > { %v3444_v48 = vor.u32 %v3703_v39, %v3443_v38  ;;  %v3415_v51 = vld [vmem:[%s5584_s5 + $0x328] sm:$0xf]  ;;  %v5524_v39 = vld [vmem:[%s5585_s6] sm:$0xff] }
 0x1a8   : > { %2263 = vmatpush.bf16.msra.mxu3 %v3380_v45  ;;  %2289 = vmatpush.bf16.msrb.mxu1 %v3384_v46  ;;  %v3045_v45 = vld [vmem:[%s5584_s5 + $0x64] sm:$0xf0]  ;;  %v3240_v46 = vor.u32 %v3653_v33, %v3239_v27  ;;  %v3605_v27 = vld [vmem:[%s5584_s5 + $0x68] sm:$0xf0]  ;;  %v3248_v33 = vor.u32 %v3654_v26, %v3247_v24  ;;  %v1555_v41 = vperm.slane %v5524_v39, 1  ;;  %v1556_v60 = vperm.slane %v5524_v39, 2 }
 0x1a9   : > { %v3048_v50 = vor.u32 %v3601_v44, %v3045_v45 }
 0x1aa   : > { %2249 = vmatpush.bf16.msra.mxu2 %v3184_v52  ;;  %2275 = vmatpush.bf16.msrb.mxu0 %v3188_v53  ;;  %v3696_v52 = vld [vmem:[%s5584_s5 + $0x340] sm:$0xf0]  ;;  %v3015_v53 = vld [vmem:[%s5584_s5 + $0x10] sm:$0xf] }
 0x1ab   : > { %v3016_v58 = vor.u32 %v3597_v54, %v3015_v53  ;;  %v1557_v54 = vperm.slane %v5524_v39, 3 }
 0x1ac   : > { %2264 = vmatpush.bf16.msra.mxu3 %v3352_v32  ;;  %2290 = vmatpush.bf16.msrb.mxu1 %v3356_v57  ;;  %v3647_v32 = vld [vmem:[%s5584_s5 + $0x1b8] sm:$0xf0]  ;;  %v3416_v57 = vor.u32 %v3696_v52, %v3415_v51 }
 0x1ae   : > { %2250 = vmatpush.bf16.msra.mxu2 %v3156_v62  ;;  %2276 = vmatpush.bf16.msrb.mxu0 %v3160_v63  ;;  %v3220_v62 = vor.u32 %v3647_v32, %v3219_v29  ;;  %v3191_v63 = vld [vmem:[%s5584_s5 + $0x168] sm:$0xf] }
 0x1af   : > { %2217 = vmatmul.bf16.vlgmr.msrb.gmra.mxu3 %v5230_v15  ;;  %2243 = vmatmul.bf16.vlgmr.msra.gmra.mxu1 %v5230_v15 }
 0x1b0   : > { %2265 = vmatpush.bf16.msra.mxu3 %v3324_v4  ;;  %2291 = vmatpush.bf16.msrb.mxu1 %v3328_v5  ;;  %v3192_v4 = vor.u32 %v3640_v0, %v3191_v63  ;;  %v3163_v5 = vld [vmem:[%s5584_s5 + $0x130] sm:$0xf] }
 0x1b2   : > { %2251 = vmatpush.bf16.msra.mxu2 %v3128_v10  ;;  %2277 = vmatpush.bf16.msrb.mxu0 %v3132_v11  ;;  %v3164_v10 = vor.u32 %v3633_v6, %v3163_v5  ;;  %v3135_v11 = vld [vmem:[%s5584_s5 + $0xf8] sm:$0xf]  ;;  %v1559_v5 = vperm.slane %v5524_v39, 5 }
 0x1b4   : > { %2266 = vmatpush.bf16.msra.mxu3 %v3296_v17  ;;  %2292 = vmatpush.bf16.msrb.mxu1 %v3300_v18  ;;  %v3136_v17 = vor.u32 %v3626_v14, %v3135_v11  ;;  %v3107_v18 = vld [vmem:[%s5584_s5 + $0xc0] sm:$0xf]  ;;  %v1558_v11 = vperm.slane %v5524_v39, 4 }
 0x1b5   : > { %2204 = vmatmul.bf16.vlgmr.msrb.gmra.mxu2 %v5270_v40  ;;  %2230 = vmatmul.bf16.vlgmr.msra.gmra.mxu0 %v5270_v40 }
 0x1b6   : > { %2252 = vmatpush.bf16.msra.mxu2 %v3100_v21  ;;  %2278 = vmatpush.bf16.msrb.mxu0 %v3104_v61  ;;  %v3108_v21 = vor.u32 %v3619_v19, %v3107_v18  ;;  %v3079_v61 = vld [vmem:[%s5584_s5 + $0x88] sm:$0xf] }
 0x1b8   : > { %2267 = vmatpush.bf16.msra.mxu3 %v3268_v30  ;;  %2293 = vmatpush.bf16.msrb.mxu1 %v3272_v31  ;;  %v3080_v30 = vor.u32 %v3612_v22, %v3079_v61  ;;  %v3051_v31 = vld [vmem:[%s5584_s5 + $0x50] sm:$0xf] }
 0x1b9   : > { %v3052_v34 = vor.u32 %v3605_v27, %v3051_v31 }
 0x1ba   : > { %2253 = vmatpush.bf16.msra.mxu2 %v3072_v36  ;;  %2279 = vmatpush.bf16.msrb.mxu0 %v3076_v37  ;;  %v3598_v36 = vld [vmem:[%s5584_s5 + $0x30] sm:$0xf0] }
 0x1bb   : > { %v3024_v37 = vor.u32 %v3598_v36, %v3023_v35 }
 0x1bc   : > { %2268 = vmatpush.bf16.msra.mxu3 %v3240_v46  ;;  %2294 = vmatpush.bf16.msrb.mxu1 %v3244_v47 }
 0x1be   : > { %2254 = vmatpush.bf16.msra.mxu2 %v3044_v49  ;;  %2280 = vmatpush.bf16.msrb.mxu0 %v3048_v50 }
 0x1bf   : > { %2269 = vmatmul.bf16.vlgmr.msra.gmra.mxu3 %v5230_v15  ;;  %2295 = vmatmul.bf16.vlgmr.msrb.gmra.mxu1 %v5230_v15 }
 0x1c0   : > { %2313 = vmatpush.bf16.msrb.mxu3 %v3444_v48  ;;  %v1554_v48 = vperm.slane %v5524_v39, 0 }
 0x1c2   : > { %2255 = vmatpush.bf16.msra.mxu2 %v3016_v58  ;;  %2281 = vmatpush.bf16.msrb.mxu0 %v3020_v59 }
 0x1c4   : > { %2314 = vmatpush.bf16.msrb.mxu3 %v3416_v57 }
 0x1c5   : > { %2256 = vmatmul.bf16.vlgmr.msra.gmra.mxu2 %v5270_v40  ;;  %2282 = vmatmul.bf16.vlgmr.msrb.gmra.mxu0 %v5270_v40 }
 0x1c6   : > { %2300 = vmatpush.bf16.msrb.mxu2 %v3220_v62 }
 0x1c8   : > { %2315 = vmatpush.bf16.msrb.mxu3 %v3388_v1 }
 0x1ca   : > { %2301 = vmatpush.bf16.msrb.mxu2 %v3192_v4 }
 0x1cc   : > { %2316 = vmatpush.bf16.msrb.mxu3 %v3360_v7 }
 0x1ce   : > { %2302 = vmatpush.bf16.msrb.mxu2 %v3164_v10 }
 0x1d0   : > { %2317 = vmatpush.bf16.msrb.mxu3 %v3332_v42 }
 0x1d2   : > { %2303 = vmatpush.bf16.msrb.mxu2 %v3136_v17 }
 0x1d4   : > { %2318 = vmatpush.bf16.msrb.mxu3 %v3304_v12 }
 0x1d6   : > { %2304 = vmatpush.bf16.msrb.mxu2 %v3108_v21  ;;  %v1560_v21 = vperm.slane %v5524_v39, 6 }
 0x1d8   : > { %2319 = vmatpush.bf16.msrb.mxu3 %v3276_v23 }
 0x1da   : > { %2305 = vmatpush.bf16.msrb.mxu2 %v3080_v30 }
 0x1dc   : > { %2320 = vmatpush.bf16.msrb.mxu3 %v3248_v33 }
 0x1de   : > { %2306 = vmatpush.bf16.msrb.mxu2 %v3052_v34 }
 0x1df   : > { %2321 = vmatmul.bf16.vlgmr.msrb.gmra.mxu3 %v5230_v15 }
 0x1e2   : > { %2307 = vmatpush.bf16.msrb.mxu2 %v3024_v37 }
 0x1e5   : > { %2308 = vmatmul.bf16.vlgmr.msrb.gmra.mxu2 %v5270_v40 }
 0x21c   : > { %v2192_v38 = vpop.f32.mrf.mxu1 }
 0x222   : > { %v2166_v43 = vpop.f32.mrf.mxu3  ;;  %v2179_v44 = vpop.f32.mrf.mxu0 }
 0x223   : > { %v2180_v45 = vadd.f32 %v2179_v44, %v1555_v41 }
 0x224   : > { %v2194_v46 = vpop.f32.mrf.mxu1 }
 0x225   : > { %v2193_v47 = vadd.f32 %v2192_v38, %v2180_v45 }
 0x227   : > { %3746 = vtanh.f32 %v2193_v47 }
 0x228   : > { %v2153_v15 = vpop.f32.mrf.mxu2 }
 0x229   : > { %v2154_v40 = vadd.f32 %v2153_v15, %v1554_v48 }
 0x22a   : > { %v2168_v49 = vpop.f32.mrf.mxu3  ;;  %v2181_v50 = vpop.f32.mrf.mxu0 }
 0x22b   : > { %v2167_v51 = vadd.f32 %v2166_v43, %v2154_v40 }
 0x22c   : > { %v2244_v52 = vpop.f32.mrf.mxu1 }
 0x22d   : > { %v3747_v53 = vpop.eup %3746  ;;  %3748 = vtanh.f32 %v2167_v51 }
 0x22e   : > { %2334 = vst [vmem:[%s5531_s21 + $0x8] sm:$0xff] %v3747_v53 }
 0x230   : > { %v2155_v55 = vpop.f32.mrf.mxu2 }
 0x232   : > { %v2218_v56 = vpop.f32.mrf.mxu3  ;;  %v2231_v29 = vpop.f32.mrf.mxu0 }
 0x233   : > { %v3749_v32 = vpop.eup %3748  ;;  %v2232_v57 = vadd.f32 %v2231_v29, %v1557_v54 }
 0x234   : > { %2333 = vst [vmem:[%s5531_s21] sm:$0xff] %v3749_v32  ;;  %v2246_v58 = vpop.f32.mrf.mxu1 }
 0x235   : > { %v2245_v59 = vadd.f32 %v2244_v52, %v2232_v57 }
 0x237   : > { %3750 = vtanh.f32 %v2245_v59 }
 0x238   : > { %v2205_v28 = vpop.f32.mrf.mxu2 }
 0x239   : > { %v2206_v62 = vadd.f32 %v2205_v28, %v1556_v60 }
 0x23a   : > { %v2220_v63 = vpop.f32.mrf.mxu3  ;;  %v2233_v0 = vpop.f32.mrf.mxu0 }
 0x23b   : > { %v2219_v1 = vadd.f32 %v2218_v56, %v2206_v62 }
 0x23c   : > { %v2296_v2 = vpop.f32.mrf.mxu1 }
 0x23d   : > { %v3751_v3 = vpop.eup %3750  ;;  %3752 = vtanh.f32 %v2219_v1 }
 0x23e   : > { %2336 = vst [vmem:[%s5531_s21 + $0x18] sm:$0xff] %v3751_v3 }
 0x240   : > { %v2207_v4 = vpop.f32.mrf.mxu2 }
 0x242   : > { %v2270_v6 = vpop.f32.mrf.mxu3  ;;  %v2283_v8 = vpop.f32.mrf.mxu0 }
 0x243   : > { %v3753_v7 = vpop.eup %3752  ;;  %v2284_v9 = vadd.f32 %v2283_v8, %v1559_v5 }
 0x244   : > { %2335 = vst [vmem:[%s5531_s21 + $0x10] sm:$0xff] %v3753_v7  ;;  %v2298_v10 = vpop.f32.mrf.mxu1 }
 0x245   : > { %v2297_v14 = vadd.f32 %v2296_v2, %v2284_v9 }
 0x247   : > { %3754 = vtanh.f32 %v2297_v14 }
 0x248   : > { %v2257_v42 = vpop.f32.mrf.mxu2 }
 0x249   : > { %v2258_v16 = vadd.f32 %v2257_v42, %v1558_v11 }
 0x24a   : > { %v2272_v13 = vpop.f32.mrf.mxu3  ;;  %v2285_v18 = vpop.f32.mrf.mxu0 }
 0x24b   : > { %v2271_v17 = vadd.f32 %v2270_v6, %v2258_v16 }
 0x24d   : > { %3756 = vtanh.f32 %v2271_v17  ;;  %v3755_v19 = vpop.eup %3754 }
 0x24e   : > { %2338 = vst [vmem:[%s5531_s21 + $0x28] sm:$0xff] %v3755_v19 }
 0x250   : > { %v2259_v12 = vpop.f32.mrf.mxu2 }
 0x253   : > { %v3757_v20 = vpop.eup %3756 }
 0x254   : > { %2337 = vst [vmem:[%s5531_s21 + $0x20] sm:$0xff] %v3757_v20 }
 0x262   : > { %v2322_v25 = vpop.f32.mrf.mxu3 }
 0x268   : > { %v2309_v61 = vpop.f32.mrf.mxu2 }
 0x269   : > { %v2310_v22 = vadd.f32 %v2309_v61, %v1560_v21 }
 0x26a   : > { %v2324_v23 = vpop.f32.mrf.mxu3 }
 0x26b   : > { %v2323_v24 = vadd.f32 %v2322_v25, %v2310_v22 }
 0x26d   : > { %3758 = vtanh.f32 %v2323_v24 }
 0x270   : > { %v2311_v26 = vpop.f32.mrf.mxu2 }
 0x273   : > { %v3759_v30 = vpop.eup %3758 }
 0x274   : > { %2339 = vst [vmem:[%s5531_s21 + $0x30] sm:$0xff] %v3759_v30 }
 0x275   : > { %3787 = shalt.err (!%p3784_p3)
}
 0x276   : > { %3707 = dma.vmem_to_hbm [thread:$0]  (%p3902_p5), %s2355_s8, 896, %s2357_s9, %s2341_s13  }
 0x277 PF: > { %p3713_p4 = scmp.ge.s32.totalorder %s3822_s27, 2  ;;  %s2368_s18 = sand.u32 1, %s3810_s24  }
 0x278   : > { %s2369_s21 = scalar_lea.sflag [#allocation3], %s2368_s18 }
 0x279   : > { %p3710_p7 = pnand %p3713_p4, %p3906_p6 }
 0x27b   : > { %p3711_p8 = pneg %p3710_p7 }
 0x27d   : > { %3805 = dma.done.wait (%p3711_p8), %s2369_s21, 896  }
 0x27e   : > { %3807 = vsyncadd (%p3711_p8), %s2369_s21, 4294966400  ;;  %p17_p9 = scmp.ge.s32.totalorder %s3889_s30, 5   ;;  %s5589_s24 = smov %s3814_s25 }
 0x27f   : > { %s5590_s25 = smov %s3818_s26  ;;  %s5591_s26 = smov %s3900_s10 }
 0x280   : > { %s5592_s27 = smov %s3889_s30  ;;  %19 = sbr.rel (!%p17_p9) target bundleno = 3 (0x3), region = 83 }
 0x285   :  { %2375 = vsyncpa [#allocation3], 1 }
 0x286   :  { %2377 = vsyncpa [#allocation3 + $0x1], 1 }

</bundles_post_ra>
